<compile_context>
chip_gen: v6e
topology: v6e:2x2x1
jax: 0.10.0
libtpu: 0.0.40
codegen_flags: <defaults>
</compile_context>

<pallas_src>
import jax
import jax.numpy as jnp
from jax.experimental import pallas as pl
from jax.experimental.pallas import tpu as pltpu


def _mul_conv1x1_kernel(s_ref, x_ref, w_ref, o_ref):
    # s_ref: (1, C_in)          per-channel scale (resident)
    # x_ref: (C_in, M)          pixels as columns  (resident)
    # w_ref: (tile_co, C_in)    weight tile
    # o_ref: (tile_co, M)       output tile
    # Fold the per-channel scale into the weight tile (scales the contraction
    # dim -> mathematically identical to scaling X). Tiny VPU work per tile.
    ws = w_ref[...] * s_ref[...]
    o_ref[...] = jnp.dot(
        ws, x_ref[...], preferred_element_type=jnp.float32
    ).astype(o_ref.dtype)                       # 1x1 conv == matmul on the MXU


def _num_tensorcores():
    # v7x-class chips expose 2 TensorCores per device (megacore); v5e/v6e have 1.
    try:
        kind = jax.devices()[0].device_kind.lower()
    except Exception:
        return 1
    return 2 if "v7" in kind else 1


def _round_up(x, m):
    return ((x + m - 1) // m) * m


def mul_conv1x1(x_nchw, scale_nc11, weight_oihw, *, num_cores=None,
                compute_dtype=None):
    """x_nchw: (1, C_in, H, W), scale_nc11: (1, C_in, 1, 1), weight: (C_out, C_in, 1, 1)."""
    n, c_in, h, w = x_nchw.shape
    c_out = weight_oihw.shape[0]
    assert n == 1 and weight_oihw.shape[1] == c_in

    m = h * w
    # Pure reshapes of contiguous memory -> no data movement, no transposes.
    x_mat = x_nchw.reshape(c_in, m)
    s_mat = scale_nc11.reshape(1, c_in)
    w_mat = weight_oihw.reshape(c_out, c_in)

    if compute_dtype is not None:
        # Optional bandwidth lever (review item); off by default to keep the
        # module's f32 numerics bit-for-bit comparable.
        x_mat = x_mat.astype(compute_dtype)
        w_mat = w_mat.astype(compute_dtype)
        s_mat = s_mat.astype(compute_dtype)

    if num_cores is None:
        num_cores = _num_tensorcores()
    num_cores = max(1, min(num_cores, c_out))

    if num_cores == 1:
        # Single TensorCore: one grid step, one big output writeback.
        tile_co = c_out
    else:
        # One (near-)even C_out tile per TensorCore, rounded to a multiple of 8.
        tile_co = min(c_out, _round_up(pl.cdiv(c_out, num_cores), 8))
    grid_steps = pl.cdiv(c_out, tile_co)

    def _resident_spec(shape):
        # Constant index_map -> DMA'd once and kept resident; single-buffer it
        # when the grid actually has multiple steps.
        if grid_steps > 1:
            try:
                return pl.BlockSpec(shape, lambda i: (0, 0),
                                    pipeline_mode=pl.Buffered(1))
            except TypeError:
                pass  # older jax without pipeline_mode kwarg: fall back
        return pl.BlockSpec(shape, lambda i: (0, 0))

    in_specs = [
        _resident_spec((1, c_in)),                       # scale, resident
        _resident_spec((c_in, m)),                       # X, resident
        pl.BlockSpec((tile_co, c_in), lambda i: (i, 0)),  # weight tile per step
    ]

    out_mat = pl.pallas_call(
        _mul_conv1x1_kernel,
        out_shape=jax.ShapeDtypeStruct((c_out, m), x_nchw.dtype),
        grid_spec=pltpu.PrefetchScalarGridSpec(
            num_scalar_prefetch=0,
            grid=(grid_steps,),
            in_specs=in_specs,
            out_specs=pl.BlockSpec((tile_co, m), lambda i: (i, 0)),
        ),
        compiler_params=pltpu.CompilerParams(
            # Independent C_out tiles -> shard across TensorCores when there
            # are 2 of them; harmless for a 1-step grid.
            dimension_semantics=("parallel",),
        ),
    )(s_mat, x_mat, w_mat)

    # (C_out, M) -> (1, C_out, H, W): free reshape, no transpose.
    return out_mat.reshape(1, c_out, h, w).astype(x_nchw.dtype)


if __name__ == "__main__":
    key = jax.random.PRNGKey(0)
    k_x, k_s, k_w = jax.random.split(key, 3)

    # Shapes implied by the module's forward pass.
    C_IN, C_OUT, H, W = 1200, 200, 14, 14
    x390 = jax.random.normal(k_x, (1, C_IN, H, W), dtype=jnp.float32)
    x395 = jax.random.normal(k_s, (1, C_IN, 1, 1), dtype=jnp.float32)
    # Deterministic synthetic weight for Conv2d(1200, 200, 1, 1, bias=False).
    weight = jax.random.normal(k_w, (C_OUT, C_IN, 1, 1), dtype=jnp.float32) * 0.02

    out = jax.block_until_ready(mul_conv1x1(x390, x395, weight))

    # Pure-JAX reference for correctness.
    ref = jax.lax.conv_general_dilated(
        x395 * x390,
        weight,
        window_strides=(1, 1),
        padding="VALID",
        dimension_numbers=("NCHW", "OIHW", "NCHW"),
    )
    assert out.shape == (1, C_OUT, H, W), out.shape
    assert jnp.allclose(out, ref, atol=1e-3, rtol=1e-3), float(
        jnp.max(jnp.abs(out - ref))
    )
    print("KERNEL_OK")
</pallas_src>

<mosaic_0001>
module attributes {stable_mosaic.version = 11 : i64} {
  func.func @_mul_conv1x1_kernel(%arg0: i32, %arg1: memref<1x1200xf32, #tpu.memory_space<vmem>>, %arg2: memref<1200x196xf32, #tpu.memory_space<vmem>>, %arg3: memref<200x1200xf32, #tpu.memory_space<vmem>>, %arg4: memref<200x196xf32, #tpu.memory_space<vmem>>) attributes {dimension_semantics = [#tpu.dimension_semantics<parallel>], iteration_bounds = array<i64: 1>, scalar_prefetch = 0 : i64, scratch_operands = 0 : i64, tpu.core_type = #tpu.core_type<tc>, window_params = [{pipeline_mode = #tpu.pipeline_mode<synchronous>, transform_indices = @transform_0, window_bounds = array<i64: 1, 1200>}, {pipeline_mode = #tpu.pipeline_mode<synchronous>, transform_indices = @transform_1, window_bounds = array<i64: 1200, 196>}, {transform_indices = @transform_2, window_bounds = array<i64: 200, 1200>}, {transform_indices = @transform_3, window_bounds = array<i64: 200, 196>}]} {
    %c0 = arith.constant 0 : index
    %c0_0 = arith.constant 0 : index
    %0 = vector.load %arg3[%c0, %c0_0] : memref<200x1200xf32, #tpu.memory_space<vmem>>, vector<200x1200xf32>
    %c0_1 = arith.constant 0 : index
    %c0_2 = arith.constant 0 : index
    %1 = vector.load %arg1[%c0_1, %c0_2] : memref<1x1200xf32, #tpu.memory_space<vmem>>, vector<1x1200xf32>
    %2 = vector.broadcast %1 : vector<1x1200xf32> to vector<200x1200xf32>
    %3 = arith.mulf %0, %2 : vector<200x1200xf32>
    %c0_3 = arith.constant 0 : index
    %c0_4 = arith.constant 0 : index
    %4 = vector.load %arg2[%c0_3, %c0_4] : memref<1200x196xf32, #tpu.memory_space<vmem>>, vector<1200x196xf32>
    %cst = arith.constant dense<0.000000e+00> : vector<200x196xf32>
    %5 = tpu.matmul %3, %4, %cst {dimension_numbers = #tpu.dot_dimension_numbers<[1], [0], [0], [1], [0, 0, 1, 1], [], []>} : vector<200x1200xf32>, vector<1200x196xf32>, vector<200x196xf32> -> vector<200x196xf32>
    %c0_5 = arith.constant 0 : index
    %c0_6 = arith.constant 0 : index
    %6 = vector.load %arg4[%c0_5, %c0_6] : memref<200x196xf32, #tpu.memory_space<vmem>>, vector<200x196xf32>
    tpu.vector_store %arg4[%c0_5, %c0_6], %5 {strides = array<i32>} : memref<200x196xf32, #tpu.memory_space<vmem>>, vector<200x196xf32>,
    return
  }
  func.func @transform_0(%arg0: i32) -> (i32, i32) {
    %c0_i32 = arith.constant 0 : i32
    %c0_i32_0 = arith.constant 0 : i32
    %c0_i32_1 = arith.constant 0 : i32
    return %c0_i32, %c0_i32_0 : i32, i32
  }
  func.func @transform_1(%arg0: i32) -> (i32, i32) {
    %c0_i32 = arith.constant 0 : i32
    %c0_i32_0 = arith.constant 0 : i32
    %c0_i32_1 = arith.constant 0 : i32
    return %c0_i32, %c0_i32_0 : i32, i32
  }
  func.func @transform_2(%arg0: i32) -> (i32, i32) {
    %c0_i32 = arith.constant 0 : i32
    %c0_i32_0 = arith.constant 0 : i32
    return %arg0, %c0_i32 : i32, i32
  }
  func.func @transform_3(%arg0: i32) -> (i32, i32) {
    %c0_i32 = arith.constant 0 : i32
    %c0_i32_0 = arith.constant 0 : i32
    return %arg0, %c0_i32 : i32, i32
  }
}

</mosaic_0001>

<bundles_post_ra>
// kernel: tpu_custom_call.1
= control target key start
LH: loop header
LB: loop body
LE: loop exit
PB: predicated region body
PF: predicated region fallthrough
CT: control target
= control target key end

     0   :  { %s4553_s0 = inlined_call_operand.vmem [shape: f32[1,1200], index: 0, kind: input, shape index: {}]   ;;  %s4554_s1 = inlined_call_operand.vmem [shape: f32[1200,196], index: 1, kind: input, shape index: {}]   ;;  %s4555_s2 = inlined_call_operand.vmem [shape: f32[200,1200], index: 2, kind: input, shape index: {}]   ;;  %s4556_s3 = inlined_call_operand.hbm [shape: f32[200,196], index: 3, kind: output, shape index: {}]  }
   0x1   :  { %v600_v0 = vld [vmem:[%s4554_s1 + $0xf8] sm:$0xff]  ;;  %v599_v2 = vld [vmem:[%s4554_s1 + $0xf0] sm:$0xff]  ;;  %v598_v4 = vld [vmem:[%s4554_s1 + $0xe8] sm:$0xff] }
   0x2   :  { %v664_v1 = vld [vmem:[%s4554_s1 + $0x2f8] sm:$0xff]  ;;  %945 = vmatprep.subr.mxu0 %v600_v0  ;;  %v663_v3 = vld [vmem:[%s4554_s1 + $0x2f0] sm:$0xff]  ;;  %v662_v5 = vld [vmem:[%s4554_s1 + $0x2e8] sm:$0xff] }
   0x3   :  { %1160 = vmatprep.subr.mxu1 %v664_v1  ;;  %946 = vmatpush1.msra.mxu0 %v599_v2  ;;  %v597_v6 = vld [vmem:[%s4554_s1 + $0xe0] sm:$0xff]  ;;  %v596_v8 = vld [vmem:[%s4554_s1 + $0xd8] sm:$0xff]  ;;  %v595_v10 = vld [vmem:[%s4554_s1 + $0xd0] sm:$0xff] }
   0x4   :  { %1161 = vmatpush1.msra.mxu1 %v663_v3  ;;  %v661_v7 = vld [vmem:[%s4554_s1 + $0x2e0] sm:$0xff]  ;;  %947 = vmatprep.subr.mxu0 %v598_v4  ;;  %v660_v9 = vld [vmem:[%s4554_s1 + $0x2d8] sm:$0xff]  ;;  %v659_v11 = vld [vmem:[%s4554_s1 + $0x2d0] sm:$0xff] }
   0x5   :  { %1162 = vmatprep.subr.mxu1 %v662_v5  ;;  %948 = vmatpush1.msra.mxu0 %v597_v6  ;;  %v594_v12 = vld [vmem:[%s4554_s1 + $0xc8] sm:$0xff]  ;;  %v593_v14 = vld [vmem:[%s4554_s1 + $0xc0] sm:$0xff]  ;;  %v592_v16 = vld [vmem:[%s4554_s1 + $0xb8] sm:$0xff] }
   0x6   :  { %1163 = vmatpush1.msra.mxu1 %v661_v7  ;;  %v658_v13 = vld [vmem:[%s4554_s1 + $0x2c8] sm:$0xff]  ;;  %949 = vmatprep.subr.mxu0 %v596_v8  ;;  %v657_v15 = vld [vmem:[%s4554_s1 + $0x2c0] sm:$0xff]  ;;  %v656_v17 = vld [vmem:[%s4554_s1 + $0x2b8] sm:$0xff] }
   0x7   :  { %1164 = vmatprep.subr.mxu1 %v660_v9  ;;  %950 = vmatpush1.msra.mxu0 %v595_v10  ;;  %v591_v18 = vld [vmem:[%s4554_s1 + $0xb0] sm:$0xff]  ;;  %v590_v20 = vld [vmem:[%s4554_s1 + $0xa8] sm:$0xff]  ;;  %v589_v22 = vld [vmem:[%s4554_s1 + $0xa0] sm:$0xff] }
   0x8   :  { %1165 = vmatpush1.msra.mxu1 %v659_v11  ;;  %951 = vmatprep.subr.mxu0 %v594_v12  ;;  %v655_v19 = vld [vmem:[%s4554_s1 + $0x2b0] sm:$0xff]  ;;  %v654_v21 = vld [vmem:[%s4554_s1 + $0x2a8] sm:$0xff]  ;;  %v653_v23 = vld [vmem:[%s4554_s1 + $0x2a0] sm:$0xff] }
   0x9   :  { %1166 = vmatprep.subr.mxu1 %v658_v13  ;;  %952 = vmatpush1.msra.mxu0 %v593_v14  ;;  %v588_v24 = vld [vmem:[%s4554_s1 + $0x98] sm:$0xff]  ;;  %v587_v26 = vld [vmem:[%s4554_s1 + $0x90] sm:$0xff]  ;;  %v586_v28 = vld [vmem:[%s4554_s1 + $0x88] sm:$0xff] }
   0xa   :  { %1167 = vmatpush1.msra.mxu1 %v657_v15  ;;  %953 = vmatprep.subr.mxu0 %v592_v16  ;;  %v652_v25 = vld [vmem:[%s4554_s1 + $0x298] sm:$0xff]  ;;  %v651_v27 = vld [vmem:[%s4554_s1 + $0x290] sm:$0xff]  ;;  %v650_v29 = vld [vmem:[%s4554_s1 + $0x288] sm:$0xff] }
   0xb   :  { %1168 = vmatprep.subr.mxu1 %v656_v17  ;;  %954 = vmatpush1.msra.mxu0 %v591_v18  ;;  %v585_v30 = vld [vmem:[%s4554_s1 + $0x80] sm:$0xff]  ;;  %v584_v32 = vld [vmem:[%s4554_s1 + $0x78] sm:$0xff]  ;;  %v583_v34 = vld [vmem:[%s4554_s1 + $0x70] sm:$0xff] }
   0xc   :  { %1169 = vmatpush1.msra.mxu1 %v655_v19  ;;  %955 = vmatprep.subr.mxu0 %v590_v20  ;;  %v649_v31 = vld [vmem:[%s4554_s1 + $0x280] sm:$0xff]  ;;  %v648_v33 = vld [vmem:[%s4554_s1 + $0x278] sm:$0xff]  ;;  %v647_v35 = vld [vmem:[%s4554_s1 + $0x270] sm:$0xff]  ;;  %v269_v20 = vlaneseq }
   0xd   :  { %1170 = vmatprep.subr.mxu1 %v654_v21  ;;  %956 = vmatpush1.msra.mxu0 %v589_v22  ;;  %v582_v36 = vld [vmem:[%s4554_s1 + $0x68] sm:$0xff]  ;;  %v581_v38 = vld [vmem:[%s4554_s1 + $0x60] sm:$0xff]  ;;  %v580_v40 = vld [vmem:[%s4554_s1 + $0x58] sm:$0xff] }
   0xe   :  { %1171 = vmatpush1.msra.mxu1 %v653_v23  ;;  %957 = vmatprep.subr.mxu0 %v588_v24  ;;  %v646_v37 = vld [vmem:[%s4554_s1 + $0x268] sm:$0xff]  ;;  %v645_v39 = vld [vmem:[%s4554_s1 + $0x260] sm:$0xff]  ;;  %v644_v41 = vld [vmem:[%s4554_s1 + $0x258] sm:$0xff] }
   0xf   :  { %1172 = vmatprep.subr.mxu1 %v652_v25  ;;  %958 = vmatpush1.msra.mxu0 %v587_v26  ;;  %v579_v42 = vld [vmem:[%s4554_s1 + $0x50] sm:$0xff]  ;;  %v578_v44 = vld [vmem:[%s4554_s1 + $0x48] sm:$0xff]  ;;  %v577_v46 = vld [vmem:[%s4554_s1 + $0x40] sm:$0xff] }
  0x10   :  { %1173 = vmatpush1.msra.mxu1 %v651_v27  ;;  %959 = vmatprep.subr.mxu0 %v586_v28  ;;  %v643_v43 = vld [vmem:[%s4554_s1 + $0x250] sm:$0xff]  ;;  %v642_v45 = vld [vmem:[%s4554_s1 + $0x248] sm:$0xff]  ;;  %v641_v47 = vld [vmem:[%s4554_s1 + $0x240] sm:$0xff] }
  0x11   :  { %1174 = vmatprep.subr.mxu1 %v650_v29  ;;  %960 = vmatpush1.msra.mxu0 %v585_v30  ;;  %v576_v48 = vld [vmem:[%s4554_s1 + $0x38] sm:$0xff]  ;;  %v575_v50 = vld [vmem:[%s4554_s1 + $0x30] sm:$0xff]  ;;  %v574_v52 = vld [vmem:[%s4554_s1 + $0x28] sm:$0xff]  ;;  %v2480_v29 = vshrl.u32 %v269_v20, 7 }
  0x12   :  { %1175 = vmatpush1.msra.mxu1 %v649_v31  ;;  %961 = vmatprep.subr.mxu0 %v584_v32  ;;  %v640_v49 = vld [vmem:[%s4554_s1 + $0x238] sm:$0xff]  ;;  %v639_v51 = vld [vmem:[%s4554_s1 + $0x230] sm:$0xff]  ;;  %v638_v53 = vld [vmem:[%s4554_s1 + $0x228] sm:$0xff] }
  0x13   :  { %1176 = vmatprep.subr.mxu1 %v648_v33  ;;  %962 = vmatpush1.msra.mxu0 %v583_v34  ;;  %v573_v54 = vld [vmem:[%s4554_s1 + $0x20] sm:$0xff]  ;;  %v572_v56 = vld [vmem:[%s4554_s1 + $0x18] sm:$0xff]  ;;  %v571_v58 = vld [vmem:[%s4554_s1 + $0x10] sm:$0xff]  ;;  %v291_v34 = vsub.s32 5, %v2480_v29 }
  0x14   :  { %1177 = vmatpush1.msra.mxu1 %v647_v35  ;;  %963 = vmatprep.subr.mxu0 %v582_v36  ;;  %v637_v55 = vld [vmem:[%s4554_s1 + $0x220] sm:$0xff]  ;;  %v636_v57 = vld [vmem:[%s4554_s1 + $0x218] sm:$0xff]  ;;  %v635_v59 = vld [vmem:[%s4554_s1 + $0x210] sm:$0xff] }
  0x15   :  { %1178 = vmatprep.subr.mxu1 %v646_v37  ;;  %964 = vmatpush1.msra.mxu0 %v581_v38  ;;  %v570_v60 = vld [vmem:[%s4554_s1 + $0x8] sm:$0xff]  ;;  %v569_v62 = vld [vmem:[%s4554_s1] sm:$0xff]  ;;  %v632_v0 = vld [vmem:[%s4554_s1 + $0x1f8] sm:$0xff]  ;;  %v299_v38 = vsub.s32 7, %v2480_v29 }
  0x16   :  { %1179 = vmatpush1.msra.mxu1 %v645_v39  ;;  %965 = vmatprep.subr.mxu0 %v580_v40  ;;  %v634_v61 = vld [vmem:[%s4554_s1 + $0x208] sm:$0xff]  ;;  %v633_v63 = vld [vmem:[%s4554_s1 + $0x200] sm:$0xff]  ;;  %v696_v1 = vld [vmem:[%s4554_s1 + $0x3f8] sm:$0xff] }
  0x17   :  { %1180 = vmatprep.subr.mxu1 %v644_v41  ;;  %966 = vmatpush1.msra.mxu0 %v579_v42  ;;  %v631_v2 = vld [vmem:[%s4554_s1 + $0x1f0] sm:$0xff]  ;;  %v630_v4 = vld [vmem:[%s4554_s1 + $0x1e8] sm:$0xff]  ;;  %v629_v6 = vld [vmem:[%s4554_s1 + $0x1e0] sm:$0xff]  ;;  %v287_v42 = vsub.s32 4, %v2480_v29 }
  0x18   :  { %1181 = vmatpush1.msra.mxu1 %v643_v43  ;;  %967 = vmatprep.subr.mxu0 %v578_v44  ;;  %v695_v3 = vld [vmem:[%s4554_s1 + $0x3f0] sm:$0xff]  ;;  %v694_v5 = vld [vmem:[%s4554_s1 + $0x3e8] sm:$0xff]  ;;  %v693_v7 = vld [vmem:[%s4554_s1 + $0x3e0] sm:$0xff] }
  0x19   :  { %1182 = vmatprep.subr.mxu1 %v642_v45  ;;  %968 = vmatpush1.msra.mxu0 %v577_v46  ;;  %v628_v8 = vld [vmem:[%s4554_s1 + $0x1d8] sm:$0xff]  ;;  %v627_v10 = vld [vmem:[%s4554_s1 + $0x1d0] sm:$0xff]  ;;  %v626_v12 = vld [vmem:[%s4554_s1 + $0x1c8] sm:$0xff]  ;;  %v295_v46 = vsub.s32 6, %v2480_v29 }
  0x1a   :  { %1183 = vmatpush1.msra.mxu1 %v641_v47  ;;  %969 = vmatprep.subr.mxu0 %v576_v48  ;;  %v692_v9 = vld [vmem:[%s4554_s1 + $0x3d8] sm:$0xff]  ;;  %v691_v11 = vld [vmem:[%s4554_s1 + $0x3d0] sm:$0xff]  ;;  %v690_v13 = vld [vmem:[%s4554_s1 + $0x3c8] sm:$0xff] }
  0x1b   :  { %1184 = vmatprep.subr.mxu1 %v640_v49  ;;  %970 = vmatpush1.msra.mxu0 %v575_v50  ;;  %v625_v14 = vld [vmem:[%s4554_s1 + $0x1c0] sm:$0xff]  ;;  %v624_v16 = vld [vmem:[%s4554_s1 + $0x1b8] sm:$0xff]  ;;  %v623_v18 = vld [vmem:[%s4554_s1 + $0x1b0] sm:$0xff] }
  0x1c   :  { %1185 = vmatpush1.msra.mxu1 %v639_v51  ;;  %971 = vmatprep.subr.mxu0 %v574_v52  ;;  %v689_v15 = vld [vmem:[%s4554_s1 + $0x3c0] sm:$0xff]  ;;  %v688_v17 = vld [vmem:[%s4554_s1 + $0x3b8] sm:$0xff]  ;;  %v687_v19 = vld [vmem:[%s4554_s1 + $0x3b0] sm:$0xff] }
  0x1d   :  { %1186 = vmatprep.subr.mxu1 %v638_v53  ;;  %972 = vmatpush1.msra.mxu0 %v573_v54  ;;  %v622_v21 = vld [vmem:[%s4554_s1 + $0x1a8] sm:$0xff]  ;;  %v621_v23 = vld [vmem:[%s4554_s1 + $0x1a0] sm:$0xff]  ;;  %v620_v25 = vld [vmem:[%s4554_s1 + $0x198] sm:$0xff] }
  0x1e   :  { %1187 = vmatpush1.msra.mxu1 %v637_v55  ;;  %973 = vmatprep.subr.mxu0 %v572_v56  ;;  %v686_v22 = vld [vmem:[%s4554_s1 + $0x3a8] sm:$0xff]  ;;  %v685_v24 = vld [vmem:[%s4554_s1 + $0x3a0] sm:$0xff]  ;;  %v684_v26 = vld [vmem:[%s4554_s1 + $0x398] sm:$0xff] }
  0x1f   :  { %1188 = vmatprep.subr.mxu1 %v636_v57  ;;  %974 = vmatpush1.msra.mxu0 %v571_v58  ;;  %v619_v27 = vld [vmem:[%s4554_s1 + $0x190] sm:$0xff]  ;;  %v618_v30 = vld [vmem:[%s4554_s1 + $0x188] sm:$0xff]  ;;  %v617_v32 = vld [vmem:[%s4554_s1 + $0x180] sm:$0xff]  ;;  %v275_v57 = vsub.s32 1, %v2480_v29 }
  0x20   :  { %1189 = vmatpush1.msra.mxu1 %v635_v59  ;;  %975 = vmatprep.subr.mxu0 %v570_v60  ;;  %v683_v28 = vld [vmem:[%s4554_s1 + $0x390] sm:$0xff]  ;;  %v682_v31 = vld [vmem:[%s4554_s1 + $0x388] sm:$0xff]  ;;  %v681_v33 = vld [vmem:[%s4554_s1 + $0x380] sm:$0xff]  ;;  %v283_v60 = vsub.s32 3, %v2480_v29 }
  0x21   :  { %1190 = vmatprep.subr.mxu1 %v634_v61  ;;  %976 = vmatpush1.msra.mxu0 %v569_v62  ;;  %v616_v35 = vld [vmem:[%s4554_s1 + $0x178] sm:$0xff]  ;;  %v2504_v37 = vld [vmem:[%s4553_s0] sm:$0xff]  ;;  %v615_v39 = vld [vmem:[%s4554_s1 + $0x170] sm:$0xff] }
  0x22   :  { %1191 = vmatpush1.msra.mxu1 %v633_v63  ;;  %977 = vmatprep.subr.mxu0 %v632_v0  ;;  %v680_v36 = vld [vmem:[%s4554_s1 + $0x378] sm:$0xff]  ;;  %v679_v40 = vld [vmem:[%s4554_s1 + $0x370] sm:$0xff]  ;;  %v2514_v41 = vrot.slane %v2504_v37, %v291_v34  ;;  %v614_v43 = vld [vmem:[%s4554_s1 + $0x168] sm:$0xff]  ;;  %v2524_v45 = vrot.slane %v2504_v37, %v299_v38  ;;  %v2534_v49 = vrot.slane %v2504_v37, %v287_v42  ;;  %v271_v63 = vsub.s32 0, %v2480_v29 }
  0x23   :  { %1192 = vmatprep.subr.mxu1 %v696_v1  ;;  %978 = vmatpush2.msra.mxu0 %v631_v2  ;;  %v678_v44 = vld [vmem:[%s4554_s1 + $0x368] sm:$0xff]  ;;  %v613_v47 = vld [vmem:[%s4554_s1 + $0x160] sm:$0xff]  ;;  %v612_v50 = vld [vmem:[%s4554_s1 + $0x158] sm:$0xff]  ;;  %v2543_v52 = vrot.slane %v2504_v37, %v295_v46  ;;  %v279_v0 = vsub.s32 2, %v2480_v29 }
  0x24   :  { %1193 = vmatpush2.msra.mxu1 %v695_v3  ;;  %979 = vmatprep.subr.mxu0 %v630_v4  ;;  %v677_v48 = vld [vmem:[%s4554_s1 + $0x360] sm:$0xff]  ;;  %v676_v51 = vld [vmem:[%s4554_s1 + $0x358] sm:$0xff]  ;;  %v611_v53 = vld [vmem:[%s4554_s1 + $0x150] sm:$0xff] }
  0x25   :  { %1194 = vmatprep.subr.mxu1 %v694_v5  ;;  %980 = vmatpush2.msra.mxu0 %v629_v6  ;;  %v675_v54 = vld [vmem:[%s4554_s1 + $0x350] sm:$0xff]  ;;  %v610_v55 = vld [vmem:[%s4554_s1 + $0x148] sm:$0xff]  ;;  %v609_v58 = vld [vmem:[%s4554_s1 + $0x140] sm:$0xff]  ;;  %v2591_v6 = vrot.slane %v2504_v37, %v275_v57 }
  0x26   :  { %1195 = vmatpush2.msra.mxu1 %v693_v7  ;;  %981 = vmatprep.subr.mxu0 %v628_v8  ;;  %v674_v56 = vld [vmem:[%s4554_s1 + $0x348] sm:$0xff]  ;;  %v673_v59 = vld [vmem:[%s4554_s1 + $0x340] sm:$0xff]  ;;  %v608_v61 = vld [vmem:[%s4554_s1 + $0x138] sm:$0xff] }
  0x27   :  { %1196 = vmatprep.subr.mxu1 %v692_v9  ;;  %982 = vmatpush2.msra.mxu0 %v627_v10  ;;  %v672_v62 = vld [vmem:[%s4554_s1 + $0x338] sm:$0xff]  ;;  %v607_v1 = vld [vmem:[%s4554_s1 + $0x130] sm:$0xff]  ;;  %v606_v3 = vld [vmem:[%s4554_s1 + $0x128] sm:$0xff]  ;;  %v2603_v10 = vrot.slane %v2504_v37, %v283_v60 }
  0x28   :  { %1197 = vmatpush2.msra.mxu1 %v691_v11  ;;  %983 = vmatprep.subr.mxu0 %v626_v12  ;;  %v671_v2 = vld [vmem:[%s4554_s1 + $0x330] sm:$0xff]  ;;  %v670_v4 = vld [vmem:[%s4554_s1 + $0x328] sm:$0xff]  ;;  %v605_v5 = vld [vmem:[%s4554_s1 + $0x120] sm:$0xff] }
  0x29   :  { %1198 = vmatprep.subr.mxu1 %v690_v13  ;;  %984 = vmatpush2.msra.mxu0 %v625_v14  ;;  %v669_v7 = vld [vmem:[%s4554_s1 + $0x320] sm:$0xff]  ;;  %v604_v8 = vld [vmem:[%s4554_s1 + $0x118] sm:$0xff]  ;;  %v16_v9 = vld [vmem:[%s4555_s2 + $0x8] sm:$0xff]  ;;  %v2617_v14 = vrot.slane %v2504_v37, %v271_v63 }
  0x2a   :  { %1199 = vmatpush2.msra.mxu1 %v689_v15  ;;  %985 = vmatprep.subr.mxu0 %v624_v16  ;;  %v668_v11 = vld [vmem:[%s4554_s1 + $0x318] sm:$0xff]  ;;  %v603_v12 = vld [vmem:[%s4554_s1 + $0x110] sm:$0xff]  ;;  %v2620_v15 = vrot.slane %v2504_v37, %v279_v0  ;;  %v666_v20 = vld [vmem:[%s4554_s1 + $0x308] sm:$0xff] }
  0x2b   :  { %1200 = vmatprep.subr.mxu1 %v688_v17  ;;  %986 = vmatpush2.msra.mxu0 %v623_v18  ;;  %v18_v13 = vld [vmem:[%s4555_s2 + $0x18] sm:$0xff]  ;;  %v667_v16 = vld [vmem:[%s4554_s1 + $0x310] sm:$0xff]  ;;  %v15_v17 = vld [vmem:[%s4555_s2] sm:$0xff] }
  0x2c   :  { %1201 = vmatpush2.msra.mxu1 %v687_v19  ;;  %987 = vmatprep.subr.mxu0 %v622_v21  ;;  %v17_v18 = vld [vmem:[%s4555_s2 + $0x10] sm:$0xff]  ;;  %v602_v19 = vld [vmem:[%s4554_s1 + $0x108] sm:$0xff]  ;;  %v320_v21 = vmul.f32 %v2591_v6, %v16_v9  ;;  %v38_v37 = vld [vmem:[%s4555_s2 + $0xb8] sm:$0xff] }
  0x2d   :  { %1202 = vmatprep.subr.mxu1 %v686_v22  ;;  %988 = vmatpush2.msra.mxu0 %v621_v23  ;;  %v26_v22 = vld [vmem:[%s4555_s2 + $0x58] sm:$0xff]  ;;  %v601_v23 = vld [vmem:[%s4554_s1 + $0x100] sm:$0xff]  ;;  %v723_v60 = vld [vmem:[%s4554_s1 + $0x4d0] sm:$0xff] }
  0x2e   :  { %1203 = vmatpush2.msra.mxu1 %v685_v24  ;;  %989 = vmatprep.subr.mxu0 %v620_v25  ;;  %v322_v24 = vmul.f32 %v2603_v10, %v18_v13  ;;  %v28_v25 = vld [vmem:[%s4555_s2 + $0x68] sm:$0xff]  ;;  %v792_v42 = vld [vmem:[%s4554_s1 + $0x6f8] sm:$0xff]  ;;  %v725_v46 = vld [vmem:[%s4554_s1 + $0x4e0] sm:$0xff] }
  0x2f   :  { %1204 = vmatprep.subr.mxu1 %v684_v26  ;;  %990 = vmatpush2.msra.mxu0 %v619_v27  ;;  %v665_v26 = vld [vmem:[%s4554_s1 + $0x300] sm:$0xff]  ;;  %v319_v27 = vmul.f32 %v2617_v14, %v15_v17  ;;  %v332_v34 = vmul.f32 %v2603_v10, %v28_v25  ;;  %v58_v9 = vld [vmem:[%s4555_s2 + $0x158] sm:$0xff]  ;;  %v57_v13 = vld [vmem:[%s4555_s2 + $0x150] sm:$0xff] }
  0x30   :  { %1205 = vmatpush2.msra.mxu1 %v683_v28  ;;  %991 = vmatprep.subr.mxu0 %v618_v30  ;;  %v321_v28 = vmul.f32 %v2620_v15, %v17_v18  ;;  %v330_v30 = vmul.f32 %v2591_v6, %v26_v22  ;;  %v47_v0 = vld [vmem:[%s4555_s2 + $0x100] sm:$0xff]  ;;  %v719_v17 = vld [vmem:[%s4554_s1 + $0x4b0] sm:$0xff]  ;;  %v68_v25 = vld [vmem:[%s4555_s2 + $0x1a8] sm:$0xff] }
  0x31   :  { %1206 = vmatprep.subr.mxu1 %v682_v31  ;;  %992 = vmatpush2.msra.mxu0 %v617_v32  ;;  %v25_v31 = vld [vmem:[%s4555_s2 + $0x50] sm:$0xff]  ;;  %v27_v32 = vld [vmem:[%s4555_s2 + $0x60] sm:$0xff] }
  0x32   :  { %1207 = vmatpush2.msra.mxu1 %v681_v33  ;;  %993 = vmatprep.subr.mxu0 %v616_v35  ;;  %v728_v33 = vld [vmem:[%s4554_s1 + $0x4f8] sm:$0xff]  ;;  %v727_v35 = vld [vmem:[%s4554_s1 + $0x4f0] sm:$0xff]  ;;  %v329_v38 = vmul.f32 %v2617_v14, %v25_v31  ;;  %v717_v31 = vld [vmem:[%s4554_s1 + $0x4a0] sm:$0xff] }
  0x33   :  { %1208 = vmatprep.subr.mxu1 %v680_v36  ;;  %994 = vmatpush2.msra.mxu0 %v615_v39  ;;  %v36_v36 = vld [vmem:[%s4555_s2 + $0xa8] sm:$0xff]  ;;  %v331_v39 = vmul.f32 %v2620_v15, %v27_v32  ;;  %v783_v32 = vld [vmem:[%s4554_s1 + $0x6b0] sm:$0xff] }
  0x34   :  { %1209 = vmatpush2.msra.mxu1 %v679_v40  ;;  %995 = vmatprep.subr.mxu0 %v614_v43  ;;  %v726_v40 = vld [vmem:[%s4554_s1 + $0x4e8] sm:$0xff]  ;;  %v35_v43 = vld [vmem:[%s4555_s2 + $0xa0] sm:$0xff] }
  0x35   :  { %1210 = vmatprep.subr.mxu1 %v678_v44  ;;  %996 = vmatpush2.msra.mxu0 %v613_v47  ;;  %v37_v44 = vld [vmem:[%s4555_s2 + $0xb0] sm:$0xff] }
  0x36   :  { %1211 = vmatpush2.msra.mxu1 %v677_v48  ;;  %997 = vmatprep.subr.mxu0 %v612_v50  ;;  %v791_v47 = vld [vmem:[%s4554_s1 + $0x6f0] sm:$0xff]  ;;  %v340_v48 = vmul.f32 %v2591_v6, %v36_v36  ;;  %v342_v50 = vmul.f32 %v2603_v10, %v38_v37  ;;  %v76_v36 = vld [vmem:[%s4555_s2 + $0x1e8] sm:$0xff]  ;;  %v716_v37 = vld [vmem:[%s4554_s1 + $0x498] sm:$0xff] }
  0x37   :  { %1212 = vmatprep.subr.mxu1 %v676_v51  ;;  %998 = vmatpush2.msra.mxu0 %v611_v53  ;;  %v46_v51 = vld [vmem:[%s4555_s2 + $0xf8] sm:$0xff] }
  0x38   :  { %1213 = vmatpush2.msra.mxu1 %v675_v54  ;;  %999 = vmatprep.subr.mxu0 %v610_v55  ;;  %v724_v53 = vld [vmem:[%s4554_s1 + $0x4d8] sm:$0xff]  ;;  %v339_v54 = vmul.f32 %v2617_v14, %v35_v43  ;;  %v341_v55 = vmul.f32 %v2620_v15, %v37_v44  ;;  %v782_v43 = vld [vmem:[%s4554_s1 + $0x6a8] sm:$0xff] }
  0x39   :  { %1214 = vmatprep.subr.mxu1 %v674_v56  ;;  %1000 = vmatpush2.msra.mxu0 %v609_v58  ;;  %v790_v56 = vld [vmem:[%s4554_s1 + $0x6e8] sm:$0xff] }
  0x3a   :  { %1215 = vmatpush2.msra.mxu1 %v673_v59  ;;  %1001 = vmatprep.subr.mxu0 %v608_v61  ;;  %v48_v58 = vld [vmem:[%s4555_s2 + $0x108] sm:$0xff]  ;;  %v45_v59 = vld [vmem:[%s4555_s2 + $0xf0] sm:$0xff]  ;;  %v789_v61 = vld [vmem:[%s4554_s1 + $0x6e0] sm:$0xff] }
  0x3b   :  { %1216 = vmatprep.subr.mxu1 %v672_v62  ;;  %1002 = vmatpush2.msra.mxu0 %v607_v1  ;;  %v350_v62 = vmul.f32 %v2591_v6, %v46_v51  ;;  %v722_v1 = vld [vmem:[%s4554_s1 + $0x4c8] sm:$0xff]  ;;  %v713_v51 = vld [vmem:[%s4554_s1 + $0x480] sm:$0xff] }
  0x3c   :  { %1217 = vmatpush2.msra.mxu1 %v671_v2  ;;  %1003 = vmatprep.subr.mxu0 %v606_v3  ;;  %v352_v2 = vmul.f32 %v2603_v10, %v48_v58  ;;  %v721_v3 = vld [vmem:[%s4554_s1 + $0x4c0] sm:$0xff]  ;;  %v714_v44 = vld [vmem:[%s4554_s1 + $0x488] sm:$0xff] }
  0x3d   :  { %1218 = vmatprep.subr.mxu1 %v670_v4  ;;  %1004 = vmatpush2.msra.mxu0 %v605_v5  ;;  %v349_v4 = vmul.f32 %v2617_v14, %v45_v59  ;;  %v56_v5 = vld [vmem:[%s4555_s2 + $0x148] sm:$0xff]  ;;  %v712_v59 = vld [vmem:[%s4554_s1 + $0x478] sm:$0xff] }
  0x3e   :  { %1219 = vmatpush2.msra.mxu1 %v669_v7  ;;  %1005 = vmatprep.subr.mxu0 %v604_v8  ;;  %v788_v7 = vld [vmem:[%s4554_s1 + $0x6d8] sm:$0xff]  ;;  %v351_v8 = vmul.f32 %v2620_v15, %v47_v0  ;;  %v360_v18 = vmul.f32 %v2591_v6, %v56_v5  ;;  %v88_v58 = vld [vmem:[%s4555_s2 + $0x248] sm:$0xff]  ;;  %v711_v0 = vld [vmem:[%s4554_s1 + $0x470] sm:$0xff] }
  0x3f   :  { %1220 = vmatprep.subr.mxu1 %v668_v11  ;;  %1006 = vmatpush2.msra.mxu0 %v603_v12  ;;  %v720_v11 = vld [vmem:[%s4554_s1 + $0x4b8] sm:$0xff]  ;;  %v55_v12 = vld [vmem:[%s4555_s2 + $0x140] sm:$0xff] }
  0x40   :  { %1221 = vmatpush2.msra.mxu1 %v667_v16  ;;  %1007 = vmatprep.subr.mxu0 %v602_v19  ;;  %v787_v16 = vld [vmem:[%s4554_s1 + $0x6d0] sm:$0xff]  ;;  %v786_v19 = vld [vmem:[%s4554_s1 + $0x6c8] sm:$0xff]  ;;  %v359_v22 = vmul.f32 %v2617_v14, %v55_v12 }
  0x41   :  { %1222 = vmatprep.subr.mxu1 %v666_v20  ;;  %1008 = vmatpush2.msra.mxu0 %v601_v23  ;;  %v362_v20 = vmul.f32 %v2603_v10, %v58_v9  ;;  %v361_v23 = vmul.f32 %v2620_v15, %v57_v13  ;;  %v98_v9 = vld [vmem:[%s4555_s2 + $0x298] sm:$0xff]  ;;  %v97_v12 = vld [vmem:[%s4555_s2 + $0x290] sm:$0xff]  ;;  %v710_v13 = vld [vmem:[%s4554_s1 + $0x468] sm:$0xff] }
  0x42   :  { %1009 = vmatprep.mubr.f32.mxu0 %v320_v21  ;;  %1223 = vmatpush2.msra.mxu1 %v665_v26  ;;  %v785_v21 = vld [vmem:[%s4554_s1 + $0x6c0] sm:$0xff]  ;;  %v65_v26 = vld [vmem:[%s4555_s2 + $0x190] sm:$0xff] }
  0x43   :  { %1224 = vmatprep.mubr.f32.mxu1 %v322_v24  ;;  %1010 = vmatmul.mubr.f32.vlgmr.msra.gmra.mxu0 %v319_v27  ;;  %v66_v24 = vld [vmem:[%s4555_s2 + $0x198] sm:$0xff]  ;;  %v718_v27 = vld [vmem:[%s4554_s1 + $0x4a8] sm:$0xff] }
  0x44   :  { %1225 = vmatmul.mubr.f32.vlgmr.msra.gmra.mxu1 %v321_v28  ;;  %1375 = vmatprep.subr.mxu0 %v728_v33  ;;  %v784_v28 = vld [vmem:[%s4554_s1 + $0x6b8] sm:$0xff]  ;;  %v370_v33 = vmul.f32 %v2591_v6, %v66_v24  ;;  %v108_v24 = vld [vmem:[%s4555_s2 + $0x2e8] sm:$0xff] }
  0x45   :  { %1015 = vmatprep.mubr.f32.mxu0 %v330_v30  ;;  %1376 = vmatpush1.msra.mxu0 %v727_v35  ;;  %v67_v30 = vld [vmem:[%s4555_s2 + $0x1a0] sm:$0xff]  ;;  %v369_v35 = vmul.f32 %v2617_v14, %v65_v26  ;;  %v708_v26 = vld [vmem:[%s4554_s1 + $0x458] sm:$0xff] }
  0x46   :  { %1230 = vmatprep.mubr.f32.mxu1 %v332_v34  ;;  %1377 = vmatprep.subr.mxu0 %v726_v40  ;;  %v372_v34 = vmul.f32 %v2603_v10, %v68_v25  ;;  %v715_v40 = vld [vmem:[%s4554_s1 + $0x490] sm:$0xff] }
  0x47   :  { %1590 = vmatprep.subr.mxu1 %v792_v42  ;;  %1016 = vmatmul.mubr.f32.gmra.mxu0 %v329_v38  ;;  %v371_v38 = vmul.f32 %v2620_v15, %v67_v30  ;;  %v75_v42 = vld [vmem:[%s4555_s2 + $0x1e0] sm:$0xff]  ;;  %v105_v25 = vld [vmem:[%s4555_s2 + $0x2d0] sm:$0xff] }
  0x48   :  { %1231 = vmatmul.mubr.f32.gmra.mxu1 %v331_v39  ;;  %1378 = vmatpush1.msra.mxu0 %v725_v46  ;;  %v78_v39 = vld [vmem:[%s4555_s2 + $0x1f8] sm:$0xff]  ;;  %v380_v46 = vmul.f32 %v2591_v6, %v76_v36  ;;  %v707_v30 = vld [vmem:[%s4554_s1 + $0x450] sm:$0xff]  ;;  %v706_v36 = vld [vmem:[%s4554_s1 + $0x448] sm:$0xff] }
  0x49   :  { %1591 = vmatpush1.msra.mxu1 %v791_v47  ;;  %1021 = vmatprep.mubr.f32.mxu0 %v340_v48  ;;  %v77_v47 = vld [vmem:[%s4555_s2 + $0x1f0] sm:$0xff]  ;;  %v781_v48 = vld [vmem:[%s4554_s1 + $0x6a0] sm:$0xff] }
  0x4a   :  { %1236 = vmatprep.mubr.f32.mxu1 %v342_v50  ;;  %1379 = vmatprep.subr.mxu0 %v724_v53  ;;  %v382_v50 = vmul.f32 %v2603_v10, %v78_v39  ;;  %v379_v53 = vmul.f32 %v2617_v14, %v75_v42  ;;  %v705_v39 = vld [vmem:[%s4554_s1 + $0x440] sm:$0xff]  ;;  %v772_v42 = vld [vmem:[%s4554_s1 + $0x658] sm:$0xff] }
  0x4b   :  { %1592 = vmatprep.subr.mxu1 %v790_v56  ;;  %1022 = vmatmul.mubr.f32.gmra.mxu0 %v339_v54  ;;  %v86_v54 = vld [vmem:[%s4555_s2 + $0x238] sm:$0xff]  ;;  %v381_v56 = vmul.f32 %v2620_v15, %v77_v47  ;;  %v771_v47 = vld [vmem:[%s4554_s1 + $0x650] sm:$0xff] }
  0x4c   :  { %1237 = vmatmul.mubr.f32.gmra.mxu1 %v341_v55  ;;  %1380 = vmatpush1.msra.mxu0 %v723_v60  ;;  %v780_v55 = vld [vmem:[%s4554_s1 + $0x698] sm:$0xff]  ;;  %v85_v60 = vld [vmem:[%s4555_s2 + $0x230] sm:$0xff] }
  0x4d   :  { %1593 = vmatpush1.msra.mxu1 %v789_v61  ;;  %1381 = vmatprep.subr.mxu0 %v722_v1  ;;  %v87_v61 = vld [vmem:[%s4555_s2 + $0x240] sm:$0xff]  ;;  %v390_v1 = vmul.f32 %v2591_v6, %v86_v54  ;;  %v389_v5 = vmul.f32 %v2617_v14, %v85_v60  ;;  %v770_v54 = vld [vmem:[%s4554_s1 + $0x648] sm:$0xff] }
  0x4e   :  { %1027 = vmatprep.mubr.f32.mxu0 %v350_v62  ;;  %1242 = vmatprep.mubr.f32.mxu1 %v352_v2  ;;  %v779_v62 = vld [vmem:[%s4554_s1 + $0x690] sm:$0xff]  ;;  %v778_v2 = vld [vmem:[%s4554_s1 + $0x688] sm:$0xff]  ;;  %v127_v60 = vld [vmem:[%s4555_s2 + $0x380] sm:$0xff] }
  0x4f   :  { %1382 = vmatpush1.msra.mxu0 %v721_v3  ;;  %1594 = vmatprep.subr.mxu1 %v788_v7  ;;  %v392_v3 = vmul.f32 %v2603_v10, %v88_v58  ;;  %v391_v7 = vmul.f32 %v2620_v15, %v87_v61  ;;  %v702_v58 = vld [vmem:[%s4554_s1 + $0x428] sm:$0xff]  ;;  %v769_v61 = vld [vmem:[%s4554_s1 + $0x640] sm:$0xff] }
  0x50   :  { %1028 = vmatmul.mubr.f32.gmra.mxu0 %v349_v4  ;;  %1243 = vmatmul.mubr.f32.gmra.mxu1 %v351_v8  ;;  %v777_v4 = vld [vmem:[%s4554_s1 + $0x680] sm:$0xff]  ;;  %v96_v8 = vld [vmem:[%s4555_s2 + $0x288] sm:$0xff] }
  0x51   :  { %1383 = vmatprep.subr.mxu0 %v720_v11  ;;  %1595 = vmatpush1.msra.mxu1 %v787_v16  ;;  %v95_v11 = vld [vmem:[%s4555_s2 + $0x280] sm:$0xff]  ;;  %v776_v16 = vld [vmem:[%s4554_s1 + $0x678] sm:$0xff] }
  0x52   :  { %1384 = vmatpush1.msra.mxu0 %v719_v17  ;;  %1596 = vmatprep.subr.mxu1 %v786_v19  ;;  %v709_v17 = vld [vmem:[%s4554_s1 + $0x460] sm:$0xff]  ;;  %v400_v19 = vmul.f32 %v2591_v6, %v96_v8  ;;  %v138_v8 = vld [vmem:[%s4555_s2 + $0x3d8] sm:$0xff] }
  0x53   :  { %1033 = vmatprep.mubr.f32.mxu0 %v360_v18  ;;  %1248 = vmatprep.mubr.f32.mxu1 %v362_v20  ;;  %v775_v18 = vld [vmem:[%s4554_s1 + $0x670] sm:$0xff]  ;;  %v402_v20 = vmul.f32 %v2603_v10, %v98_v9  ;;  %v135_v9 = vld [vmem:[%s4555_s2 + $0x3c0] sm:$0xff] }
  0x54   :  { %1597 = vmatpush1.msra.mxu1 %v785_v21  ;;  %1034 = vmatmul.mubr.f32.gmra.mxu0 %v359_v22  ;;  %v399_v21 = vmul.f32 %v2617_v14, %v95_v11  ;;  %v401_v22 = vmul.f32 %v2620_v15, %v97_v12  ;;  %v700_v11 = vld [vmem:[%s4554_s1 + $0x418] sm:$0xff]  ;;  %v766_v12 = vld [vmem:[%s4554_s1 + $0x628] sm:$0xff] }
  0x55   :  { %1249 = vmatmul.mubr.f32.gmra.mxu1 %v361_v23  ;;  %1385 = vmatprep.subr.mxu0 %v718_v27  ;;  %v106_v23 = vld [vmem:[%s4555_s2 + $0x2d8] sm:$0xff]  ;;  %v774_v27 = vld [vmem:[%s4554_s1 + $0x668] sm:$0xff] }
  0x56   :  { %1598 = vmatprep.subr.mxu1 %v784_v28  ;;  %1386 = vmatpush1.msra.mxu0 %v717_v31  ;;  %v107_v28 = vld [vmem:[%s4555_s2 + $0x2e0] sm:$0xff] }
  0x57   :  { %1599 = vmatpush1.msra.mxu1 %v783_v32  ;;  %1039 = vmatprep.mubr.f32.mxu0 %v370_v33  ;;  %v773_v31 = vld [vmem:[%s4554_s1 + $0x660] sm:$0xff]  ;;  %v410_v32 = vmul.f32 %v2591_v6, %v106_v23  ;;  %v412_v33 = vmul.f32 %v2603_v10, %v108_v24  ;;  %v148_v24 = vld [vmem:[%s4555_s2 + $0x428] sm:$0xff] }
  0x58   :  { %1254 = vmatprep.mubr.f32.mxu1 %v372_v34  ;;  %1387 = vmatprep.subr.mxu0 %v716_v37  ;;  %v409_v34 = vmul.f32 %v2617_v14, %v105_v25  ;;  %v411_v37 = vmul.f32 %v2620_v15, %v107_v28  ;;  %v697_v25 = vld [vmem:[%s4554_s1 + $0x400] sm:$0xff]  ;;  %v760_v28 = vld [vmem:[%s4554_s1 + $0x5f8] sm:$0xff] }
  0x59   :  { %1040 = vmatmul.mubr.f32.gmra.mxu0 %v369_v35  ;;  %1255 = vmatmul.mubr.f32.gmra.mxu1 %v371_v38  ;;  %v116_v35 = vld [vmem:[%s4555_s2 + $0x328] sm:$0xff]  ;;  %v118_v38 = vld [vmem:[%s4555_s2 + $0x338] sm:$0xff] }
  0x5a   :  { %1388 = vmatpush1.msra.mxu0 %v715_v40  ;;  %1600 = vmatprep.subr.mxu1 %v782_v43  ;;  %v115_v40 = vld [vmem:[%s4555_s2 + $0x320] sm:$0xff]  ;;  %v704_v43 = vld [vmem:[%s4554_s1 + $0x438] sm:$0xff] }
  0x5b   :  { %1389 = vmatprep.subr.mxu0 %v714_v44  ;;  %1601 = vmatpush1.msra.mxu1 %v781_v48  ;;  %v420_v44 = vmul.f32 %v2591_v6, %v116_v35  ;;  %v422_v48 = vmul.f32 %v2603_v10, %v118_v38  ;;  %v759_v35 = vld [vmem:[%s4554_s1 + $0x5f0] sm:$0xff]  ;;  %v762_v38 = vld [vmem:[%s4554_s1 + $0x608] sm:$0xff] }
  0x5c   :  { %1045 = vmatprep.mubr.f32.mxu0 %v380_v46  ;;  %1260 = vmatprep.mubr.f32.mxu1 %v382_v50  ;;  %v117_v46 = vld [vmem:[%s4555_s2 + $0x330] sm:$0xff] }
  0x5d   :  { %1390 = vmatpush1.msra.mxu0 %v713_v51  ;;  %1602 = vmatprep.subr.mxu1 %v780_v55  ;;  %v703_v50 = vld [vmem:[%s4554_s1 + $0x430] sm:$0xff]  ;;  %v419_v51 = vmul.f32 %v2617_v14, %v115_v40  ;;  %v421_v55 = vmul.f32 %v2620_v15, %v117_v46  ;;  %v758_v40 = vld [vmem:[%s4554_s1 + $0x5e8] sm:$0xff]  ;;  %v761_v46 = vld [vmem:[%s4554_s1 + $0x600] sm:$0xff] }
  0x5e   :  { %1046 = vmatmul.mubr.f32.gmra.mxu0 %v379_v53  ;;  %1261 = vmatmul.mubr.f32.gmra.mxu1 %v381_v56  ;;  %v126_v53 = vld [vmem:[%s4555_s2 + $0x378] sm:$0xff]  ;;  %v128_v56 = vld [vmem:[%s4555_s2 + $0x388] sm:$0xff] }
  0x5f   :  { %1391 = vmatprep.subr.mxu0 %v712_v59  ;;  %1603 = vmatpush1.msra.mxu1 %v779_v62  ;;  %v125_v59 = vld [vmem:[%s4555_s2 + $0x370] sm:$0xff]  ;;  %v701_v62 = vld [vmem:[%s4554_s1 + $0x420] sm:$0xff] }
  0x60   :  { %1392 = vmatpush1.msra.mxu0 %v711_v0  ;;  %1604 = vmatprep.subr.mxu1 %v778_v2  ;;  %v430_v0 = vmul.f32 %v2591_v6, %v126_v53  ;;  %v432_v2 = vmul.f32 %v2603_v10, %v128_v56  ;;  %v823_v53 = vld [vmem:[%s4554_s1 + $0x7f0] sm:$0xff]  ;;  %v168_v56 = vld [vmem:[%s4555_s2 + $0x4c8] sm:$0xff] }
  0x61   :  { %1051 = vmatprep.mubr.f32.mxu0 %v390_v1  ;;  %1266 = vmatprep.mubr.f32.mxu1 %v392_v3  ;;  %v768_v1 = vld [vmem:[%s4554_s1 + $0x638] sm:$0xff]  ;;  %v767_v3 = vld [vmem:[%s4554_s1 + $0x630] sm:$0xff] }
  0x62   :  { %1605 = vmatpush1.msra.mxu1 %v777_v4  ;;  %1052 = vmatmul.mubr.f32.gmra.mxu0 %v389_v5  ;;  %v429_v4 = vmul.f32 %v2617_v14, %v125_v59  ;;  %v431_v5 = vmul.f32 %v2620_v15, %v127_v60  ;;  %v167_v59 = vld [vmem:[%s4555_s2 + $0x4c0] sm:$0xff]  ;;  %v756_v60 = vld [vmem:[%s4554_s1 + $0x5d8] sm:$0xff] }
  0x63   :  { %1267 = vmatmul.mubr.f32.gmra.mxu1 %v391_v7  ;;  %1393 = vmatprep.subr.mxu0 %v710_v13  ;;  %v136_v7 = vld [vmem:[%s4555_s2 + $0x3c8] sm:$0xff]  ;;  %v137_v13 = vld [vmem:[%s4555_s2 + $0x3d0] sm:$0xff] }
  0x64   :  { %1606 = vmatprep.subr.mxu1 %v776_v16  ;;  %1394 = vmatpush1.msra.mxu0 %v709_v17  ;;  %v699_v16 = vld [vmem:[%s4554_s1 + $0x410] sm:$0xff]  ;;  %v765_v17 = vld [vmem:[%s4554_s1 + $0x620] sm:$0xff]  ;;  %v441_v23 = vmul.f32 %v2620_v15, %v137_v13 }
  0x65   :  { %1607 = vmatpush1.msra.mxu1 %v775_v18  ;;  %1057 = vmatprep.mubr.f32.mxu0 %v400_v19  ;;  %v440_v18 = vmul.f32 %v2591_v6, %v136_v7  ;;  %v442_v19 = vmul.f32 %v2603_v10, %v138_v8  ;;  %v178_v7 = vld [vmem:[%s4555_s2 + $0x518] sm:$0xff]  ;;  %v175_v8 = vld [vmem:[%s4555_s2 + $0x500] sm:$0xff] }
  0x66   :  { %1272 = vmatprep.mubr.f32.mxu1 %v402_v20  ;;  %1058 = vmatmul.mubr.f32.gmra.mxu0 %v399_v21  ;;  %v439_v20 = vmul.f32 %v2617_v14, %v135_v9  ;;  %v146_v21 = vld [vmem:[%s4555_s2 + $0x418] sm:$0xff]  ;;  %v754_v9 = vld [vmem:[%s4554_s1 + $0x5c8] sm:$0xff]  ;;  %v753_v13 = vld [vmem:[%s4554_s1 + $0x5c0] sm:$0xff] }
  0x67   :  { %1273 = vmatmul.mubr.f32.gmra.mxu1 %v401_v22  ;;  %1395 = vmatprep.subr.mxu0 %v708_v26  ;;  %v698_v22 = vld [vmem:[%s4554_s1 + $0x408] sm:$0xff]  ;;  %v145_v26 = vld [vmem:[%s4555_s2 + $0x410] sm:$0xff] }
  0x68   :  { %1608 = vmatprep.subr.mxu1 %v774_v27  ;;  %1396 = vmatpush1.msra.mxu0 %v707_v30  ;;  %v764_v27 = vld [vmem:[%s4554_s1 + $0x618] sm:$0xff]  ;;  %v450_v30 = vmul.f32 %v2591_v6, %v146_v21 }
  0x69   :  { %1609 = vmatpush1.msra.mxu1 %v773_v31  ;;  %1063 = vmatprep.mubr.f32.mxu0 %v410_v32  ;;  %v147_v31 = vld [vmem:[%s4555_s2 + $0x420] sm:$0xff]  ;;  %v763_v32 = vld [vmem:[%s4554_s1 + $0x610] sm:$0xff]  ;;  %v752_v21 = vld [vmem:[%s4554_s1 + $0x5b8] sm:$0xff] }
  0x6a   :  { %1278 = vmatprep.mubr.f32.mxu1 %v412_v33  ;;  %1397 = vmatprep.subr.mxu0 %v706_v36  ;;  %v452_v33 = vmul.f32 %v2603_v10, %v148_v24  ;;  %v449_v36 = vmul.f32 %v2617_v14, %v145_v26  ;;  %v751_v24 = vld [vmem:[%s4554_s1 + $0x5b0] sm:$0xff]  ;;  %v818_v26 = vld [vmem:[%s4554_s1 + $0x7c8] sm:$0xff] }
  0x6b   :  { %1064 = vmatmul.mubr.f32.gmra.mxu0 %v409_v34  ;;  %1279 = vmatmul.mubr.f32.gmra.mxu1 %v411_v37  ;;  %v156_v34 = vld [vmem:[%s4555_s2 + $0x468] sm:$0xff]  ;;  %v158_v37 = vld [vmem:[%s4555_s2 + $0x478] sm:$0xff] }
  0x6c   :  { %1398 = vmatpush1.msra.mxu0 %v705_v39  ;;  %1610 = vmatprep.subr.mxu1 %v772_v42  ;;  %v451_v39 = vmul.f32 %v2620_v15, %v147_v31  ;;  %v460_v42 = vmul.f32 %v2591_v6, %v156_v34  ;;  %v817_v31 = vld [vmem:[%s4554_s1 + $0x7c0] sm:$0xff] }
  0x6d   :  { %1399 = vmatprep.subr.mxu0 %v704_v43  ;;  %1611 = vmatpush1.msra.mxu1 %v771_v47  ;;  %v155_v43 = vld [vmem:[%s4555_s2 + $0x460] sm:$0xff]  ;;  %v462_v47 = vmul.f32 %v2603_v10, %v158_v37 }
  0x6e   :  { %1069 = vmatprep.mubr.f32.mxu0 %v420_v44  ;;  %1284 = vmatprep.mubr.f32.mxu1 %v422_v48  ;;  %v157_v44 = vld [vmem:[%s4555_s2 + $0x470] sm:$0xff]  ;;  %v824_v48 = vld [vmem:[%s4554_s1 + $0x7f8] sm:$0xff] }
  0x6f   :  { %1400 = vmatpush1.msra.mxu0 %v703_v50  ;;  %1612 = vmatprep.subr.mxu1 %v770_v54  ;;  %v166_v50 = vld [vmem:[%s4555_s2 + $0x4b8] sm:$0xff]  ;;  %v459_v54 = vmul.f32 %v2617_v14, %v155_v43  ;;  %v815_v43 = vld [vmem:[%s4554_s1 + $0x7b0] sm:$0xff] }
  0x70   :  { %1070 = vmatmul.mubr.f32.gmra.mxu0 %v419_v51  ;;  %1285 = vmatmul.mubr.f32.gmra.mxu1 %v421_v55  ;;  %v757_v51 = vld [vmem:[%s4554_s1 + $0x5e0] sm:$0xff]  ;;  %v461_v55 = vmul.f32 %v2620_v15, %v157_v44  ;;  %v747_v44 = vld [vmem:[%s4554_s1 + $0x590] sm:$0xff] }
  0x71   :  { %1401 = vmatprep.subr.mxu0 %v702_v58  ;;  %1613 = vmatpush1.msra.mxu1 %v769_v61  ;;  %v165_v58 = vld [vmem:[%s4555_s2 + $0x4b0] sm:$0xff]  ;;  %v822_v61 = vld [vmem:[%s4554_s1 + $0x7e8] sm:$0xff] }
  0x72   :  { %1402 = vmatpush1.msra.mxu0 %v701_v62  ;;  %1614 = vmatprep.subr.mxu1 %v768_v1  ;;  %v470_v62 = vmul.f32 %v2591_v6, %v166_v50  ;;  %v472_v1 = vmul.f32 %v2603_v10, %v168_v56  ;;  %v813_v50 = vld [vmem:[%s4554_s1 + $0x7a0] sm:$0xff]  ;;  %v205_v56 = vld [vmem:[%s4555_s2 + $0x5f0] sm:$0xff] }
  0x73   :  { %1075 = vmatprep.mubr.f32.mxu0 %v430_v0  ;;  %1290 = vmatprep.mubr.f32.mxu1 %v432_v2  ;;  %v755_v0 = vld [vmem:[%s4554_s1 + $0x5d0] sm:$0xff]  ;;  %v821_v2 = vld [vmem:[%s4554_s1 + $0x7e0] sm:$0xff] }
  0x74   :  { %1615 = vmatpush1.msra.mxu1 %v767_v3  ;;  %1076 = vmatmul.mubr.f32.gmra.mxu0 %v429_v4  ;;  %v469_v3 = vmul.f32 %v2617_v14, %v165_v58  ;;  %v471_v4 = vmul.f32 %v2620_v15, %v167_v59  ;;  %v746_v58 = vld [vmem:[%s4554_s1 + $0x588] sm:$0xff]  ;;  %v812_v59 = vld [vmem:[%s4554_s1 + $0x798] sm:$0xff] }
  0x75   :  { %1291 = vmatmul.mubr.f32.gmra.mxu1 %v431_v5  ;;  %1403 = vmatprep.subr.mxu0 %v700_v11  ;;  %v176_v5 = vld [vmem:[%s4555_s2 + $0x508] sm:$0xff]  ;;  %v820_v11 = vld [vmem:[%s4554_s1 + $0x7d8] sm:$0xff] }
  0x76   :  { %1616 = vmatprep.subr.mxu1 %v766_v12  ;;  %1404 = vmatpush1.msra.mxu0 %v699_v16  ;;  %v177_v12 = vld [vmem:[%s4555_s2 + $0x510] sm:$0xff] }
  0x77   :  { %1617 = vmatpush1.msra.mxu1 %v765_v17  ;;  %1081 = vmatprep.mubr.f32.mxu0 %v440_v18  ;;  %v819_v16 = vld [vmem:[%s4554_s1 + $0x7d0] sm:$0xff]  ;;  %v480_v17 = vmul.f32 %v2591_v6, %v176_v5  ;;  %v482_v18 = vmul.f32 %v2603_v10, %v178_v7  ;;  %v744_v5 = vld [vmem:[%s4554_s1 + $0x578] sm:$0xff] }
  0x78   :  { %1296 = vmatprep.mubr.f32.mxu1 %v442_v19  ;;  %1405 = vmatprep.subr.mxu0 %v698_v22  ;;  %v479_v19 = vmul.f32 %v2617_v14, %v175_v8  ;;  %v481_v22 = vmul.f32 %v2620_v15, %v177_v12  ;;  %v743_v8 = vld [vmem:[%s4554_s1 + $0x570] sm:$0xff] }
  0x79   :  { %1082 = vmatmul.mubr.f32.gmra.mxu0 %v439_v20  ;;  %1297 = vmatmul.mubr.f32.gmra.mxu1 %v441_v23  ;;  %v186_v20 = vld [vmem:[%s4555_s2 + $0x558] sm:$0xff]  ;;  %v188_v23 = vld [vmem:[%s4555_s2 + $0x568] sm:$0xff]  ;;  %v217_v12 = vld [vmem:[%s4555_s2 + $0x650] sm:$0xff] }
  0x7a   :  { %1406 = vmatpush1.msra.mxu0 %v697_v25  ;;  %1618 = vmatprep.subr.mxu1 %v764_v27  ;;  %v185_v25 = vld [vmem:[%s4555_s2 + $0x550] sm:$0xff]  ;;  %v750_v27 = vld [vmem:[%s4554_s1 + $0x5a8] sm:$0xff] }
  0x7b   :  { %1407 = vmatprep.subr.mxu0 %v760_v28  ;;  %1619 = vmatpush1.msra.mxu1 %v763_v32  ;;  %v490_v28 = vmul.f32 %v2591_v6, %v186_v20  ;;  %v492_v32 = vmul.f32 %v2603_v10, %v188_v23  ;;  %v489_v34 = vmul.f32 %v2617_v14, %v185_v25  ;;  %v808_v20 = vld [vmem:[%s4554_s1 + $0x778] sm:$0xff]  ;;  %v228_v23 = vld [vmem:[%s4555_s2 + $0x6a8] sm:$0xff]  ;;  %v741_v25 = vld [vmem:[%s4554_s1 + $0x560] sm:$0xff] }
  0x7c   :  { %1087 = vmatprep.mubr.f32.mxu0 %v450_v30  ;;  %1302 = vmatprep.mubr.f32.mxu1 %v452_v33  ;;  %v187_v30 = vld [vmem:[%s4555_s2 + $0x560] sm:$0xff] }
  0x7d   :  { %1408 = vmatpush2.msra.mxu0 %v759_v35  ;;  %1620 = vmatprep.subr.mxu1 %v762_v38  ;;  %v749_v33 = vld [vmem:[%s4554_s1 + $0x5a0] sm:$0xff]  ;;  %v196_v35 = vld [vmem:[%s4555_s2 + $0x5a8] sm:$0xff]  ;;  %v491_v37 = vmul.f32 %v2620_v15, %v187_v30  ;;  %v198_v38 = vld [vmem:[%s4555_s2 + $0x5b8] sm:$0xff] }
  0x7e   :  { %1088 = vmatmul.mubr.f32.gmra.mxu0 %v449_v36  ;;  %1303 = vmatmul.mubr.f32.gmra.mxu1 %v451_v39  ;;  %v816_v36 = vld [vmem:[%s4554_s1 + $0x7b8] sm:$0xff] }
  0x7f   :  { %1409 = vmatprep.subr.mxu0 %v758_v40  ;;  %1621 = vmatpush1.msra.mxu1 %v761_v46  ;;  %v748_v39 = vld [vmem:[%s4554_s1 + $0x598] sm:$0xff]  ;;  %v195_v40 = vld [vmem:[%s4555_s2 + $0x5a0] sm:$0xff]  ;;  %v500_v46 = vmul.f32 %v2591_v6, %v196_v35  ;;  %v806_v35 = vld [vmem:[%s4554_s1 + $0x768] sm:$0xff] }
  0x80   :  { %1093 = vmatprep.mubr.f32.mxu0 %v460_v42  ;;  %1622 = vmatprep.subr.mxu1 %v824_v48  ;;  %v197_v42 = vld [vmem:[%s4555_s2 + $0x5b0] sm:$0xff]  ;;  %v502_v48 = vmul.f32 %v2603_v10, %v198_v38  ;;  %v740_v30 = vld [vmem:[%s4554_s1 + $0x558] sm:$0xff]  ;;  %v738_v38 = vld [vmem:[%s4554_s1 + $0x548] sm:$0xff] }
  0x81   :  { %1308 = vmatprep.mubr.f32.mxu1 %v462_v47  ;;  %1410 = vmatpush2.msra.mxu0 %v757_v51  ;;  %v814_v47 = vld [vmem:[%s4554_s1 + $0x7a8] sm:$0xff]  ;;  %v499_v51 = vmul.f32 %v2617_v14, %v195_v40  ;;  %v237_v40 = vld [vmem:[%s4555_s2 + $0x6f0] sm:$0xff] }
  0x82   :  { %1623 = vmatpush2.msra.mxu1 %v823_v53  ;;  %1094 = vmatmul.mubr.f32.gmra.mxu0 %v459_v54  ;;  %v501_v53 = vmul.f32 %v2620_v15, %v197_v42  ;;  %v206_v54 = vld [vmem:[%s4555_s2 + $0x5f8] sm:$0xff]  ;;  %v805_v42 = vld [vmem:[%s4554_s1 + $0x760] sm:$0xff] }
  0x83   :  { %1309 = vmatmul.mubr.f32.gmra.mxu1 %v461_v55  ;;  %1411 = vmatprep.subr.mxu0 %v756_v60  ;;  %v208_v55 = vld [vmem:[%s4555_s2 + $0x608] sm:$0xff]  ;;  %v207_v60 = vld [vmem:[%s4555_s2 + $0x600] sm:$0xff] }
  0x84   :  { %1624 = vmatprep.subr.mxu1 %v822_v61  ;;  %1412 = vmatpush2.msra.mxu0 %v755_v0  ;;  %v745_v61 = vld [vmem:[%s4554_s1 + $0x580] sm:$0xff]  ;;  %v510_v0 = vmul.f32 %v2591_v6, %v206_v54  ;;  %v511_v7 = vmul.f32 %v2620_v15, %v207_v60  ;;  %v248_v54 = vld [vmem:[%s4555_s2 + $0x748] sm:$0xff]  ;;  %v735_v60 = vld [vmem:[%s4554_s1 + $0x530] sm:$0xff] }
  0x85   :  { %1099 = vmatprep.mubr.f32.mxu0 %v470_v62  ;;  %1314 = vmatprep.mubr.f32.mxu1 %v472_v1  ;;  %v811_v62 = vld [vmem:[%s4554_s1 + $0x790] sm:$0xff]  ;;  %v512_v1 = vmul.f32 %v2603_v10, %v208_v55 }
  0x86   :  { %1625 = vmatpush2.msra.mxu1 %v821_v2  ;;  %1100 = vmatmul.mubr.f32.gmra.mxu0 %v469_v3  ;;  %v216_v2 = vld [vmem:[%s4555_s2 + $0x648] sm:$0xff]  ;;  %v509_v3 = vmul.f32 %v2617_v14, %v205_v56  ;;  %v245_v55 = vld [vmem:[%s4555_s2 + $0x730] sm:$0xff]  ;;  %v736_v56 = vld [vmem:[%s4554_s1 + $0x538] sm:$0xff] }
  0x87   :  { %1315 = vmatmul.mubr.f32.gmra.mxu1 %v471_v4  ;;  %1413 = vmatprep.subr.mxu0 %v754_v9  ;;  %v218_v4 = vld [vmem:[%s4555_s2 + $0x658] sm:$0xff]  ;;  %v520_v9 = vmul.f32 %v2591_v6, %v216_v2  ;;  %v256_v2 = vld [vmem:[%s4555_s2 + $0x788] sm:$0xff] }
  0x88   :  { %1626 = vmatprep.subr.mxu1 %v820_v11  ;;  %1414 = vmatpush2.msra.mxu0 %v753_v13  ;;  %v215_v11 = vld [vmem:[%s4555_s2 + $0x640] sm:$0xff]  ;;  %v810_v13 = vld [vmem:[%s4554_s1 + $0x788] sm:$0xff] }
  0x89   :  { %1627 = vmatpush2.msra.mxu1 %v819_v16  ;;  %1105 = vmatprep.mubr.f32.mxu0 %v480_v17  ;;  %v522_v16 = vmul.f32 %v2603_v10, %v218_v4  ;;  %v809_v17 = vld [vmem:[%s4554_s1 + $0x780] sm:$0xff] }
  0x8a   :  { %1320 = vmatprep.mubr.f32.mxu1 %v482_v18  ;;  %1415 = vmatprep.subr.mxu0 %v752_v21  ;;  %v226_v18 = vld [vmem:[%s4555_s2 + $0x698] sm:$0xff]  ;;  %v519_v21 = vmul.f32 %v2617_v14, %v215_v11  ;;  %v560_v11 = vmul.f32 %v2591_v6, %v256_v2 }
  0x8b   :  { %1106 = vmatmul.mubr.f32.gmra.mxu0 %v479_v19  ;;  %1321 = vmatmul.mubr.f32.gmra.mxu1 %v481_v22  ;;  %v742_v19 = vld [vmem:[%s4554_s1 + $0x568] sm:$0xff]  ;;  %v521_v22 = vmul.f32 %v2620_v15, %v217_v12  ;;  %v255_v12 = vld [vmem:[%s4555_s2 + $0x780] sm:$0xff] }
  0x8c   :  { %1416 = vmatpush2.msra.mxu0 %v751_v24  ;;  %1628 = vmatprep.subr.mxu1 %v818_v26  ;;  %v225_v24 = vld [vmem:[%s4555_s2 + $0x690] sm:$0xff] }
  0x8d   :  { %1417 = vmatprep.subr.mxu0 %v750_v27  ;;  %1629 = vmatpush2.msra.mxu1 %v817_v31  ;;  %v807_v26 = vld [vmem:[%s4554_s1 + $0x770] sm:$0xff]  ;;  %v530_v27 = vmul.f32 %v2591_v6, %v226_v18  ;;  %v532_v31 = vmul.f32 %v2603_v10, %v228_v23  ;;  %v22_v23 = vld [vmem:[%s4555_s2 + $0x38] sm:$0xff] }
  0x8e   :  { %1111 = vmatprep.mubr.f32.mxu0 %v490_v28  ;;  %1326 = vmatprep.mubr.f32.mxu1 %v492_v32  ;;  %v227_v28 = vld [vmem:[%s4555_s2 + $0x6a0] sm:$0xff]  ;;  %v739_v32 = vld [vmem:[%s4554_s1 + $0x550] sm:$0xff] }
  0x8f   :  { %1418 = vmatpush2.msra.mxu0 %v749_v33  ;;  %1630 = vmatprep.subr.mxu1 %v816_v36  ;;  %v529_v33 = vmul.f32 %v2617_v14, %v225_v24  ;;  %v531_v36 = vmul.f32 %v2620_v15, %v227_v28  ;;  %v731_v18 = vld [vmem:[%s4554_s1 + $0x510] sm:$0xff]  ;;  %v30_v28 = vld [vmem:[%s4555_s2 + $0x78] sm:$0xff] }
  0x90   :  { %1112 = vmatmul.mubr.f32.gmra.mxu0 %v489_v34  ;;  %1327 = vmatmul.mubr.f32.gmra.mxu1 %v491_v37  ;;  %v236_v34 = vld [vmem:[%s4555_s2 + $0x6e8] sm:$0xff]  ;;  %v238_v37 = vld [vmem:[%s4555_s2 + $0x6f8] sm:$0xff]  ;;  %v21_v24 = vld [vmem:[%s4555_s2 + $0x30] sm:$0xff] }
  0x91   :  { %1419 = vmatprep.subr.mxu0 %v748_v39  ;;  %1631 = vmatpush2.msra.mxu1 %v815_v43  ;;  %v235_v39 = vld [vmem:[%s4555_s2 + $0x6e0] sm:$0xff] }
  0x92   :  { %1420 = vmatpush2.msra.mxu0 %v747_v44  ;;  %1632 = vmatprep.subr.mxu1 %v814_v47  ;;  %v737_v43 = vld [vmem:[%s4554_s1 + $0x540] sm:$0xff]  ;;  %v540_v44 = vmul.f32 %v2591_v6, %v236_v34  ;;  %v542_v47 = vmul.f32 %v2603_v10, %v238_v37  ;;  %v29_v37 = vld [vmem:[%s4555_s2 + $0x70] sm:$0xff] }
  0x93   :  { %1117 = vmatprep.mubr.f32.mxu0 %v500_v46  ;;  %1332 = vmatprep.mubr.f32.mxu1 %v502_v48  ;;  %v804_v46 = vld [vmem:[%s4554_s1 + $0x758] sm:$0xff]  ;;  %v803_v48 = vld [vmem:[%s4554_s1 + $0x750] sm:$0xff] }
  0x94   :  { %1633 = vmatpush2.msra.mxu1 %v813_v50  ;;  %1118 = vmatmul.mubr.f32.gmra.mxu0 %v499_v51  ;;  %v539_v50 = vmul.f32 %v2617_v14, %v235_v39  ;;  %v541_v51 = vmul.f32 %v2620_v15, %v237_v40  ;;  %v856_v39 = vld [vmem:[%s4554_s1 + $0x8f8] sm:$0xff] }
  0x95   :  { %1333 = vmatmul.mubr.f32.gmra.mxu1 %v501_v53  ;;  %1421 = vmatprep.subr.mxu0 %v746_v58  ;;  %v246_v53 = vld [vmem:[%s4555_s2 + $0x738] sm:$0xff]  ;;  %v802_v58 = vld [vmem:[%s4554_s1 + $0x748] sm:$0xff] }
  0x96   :  { %1634 = vmatprep.subr.mxu1 %v812_v59  ;;  %1422 = vmatpush2.msra.mxu0 %v745_v61  ;;  %v247_v59 = vld [vmem:[%s4555_s2 + $0x740] sm:$0xff] }
  0x97   :  { %1635 = vmatpush2.msra.mxu1 %v811_v62  ;;  %1123 = vmatprep.mubr.f32.mxu0 %v510_v0  ;;  %v801_v61 = vld [vmem:[%s4554_s1 + $0x740] sm:$0xff]  ;;  %v550_v62 = vmul.f32 %v2591_v6, %v246_v53  ;;  %v552_v0 = vmul.f32 %v2603_v10, %v248_v54  ;;  %v551_v4 = vmul.f32 %v2620_v15, %v247_v59  ;;  %v798_v6 = vld [vmem:[%s4554_s1 + $0x728] sm:$0xff] }
  0x98   :  { %1338 = vmatprep.mubr.f32.mxu1 %v512_v1  ;;  %1423 = vmatprep.subr.mxu0 %v744_v5  ;;  %v549_v1 = vmul.f32 %v2617_v14, %v245_v55  ;;  %v258_v5 = vld [vmem:[%s4555_s2 + $0x798] sm:$0xff] }
  0x99   :  { %1124 = vmatmul.mubr.f32.gmra.mxu0 %v509_v3  ;;  %1339 = vmatmul.mubr.f32.gmra.mxu1 %v511_v7  ;;  %v734_v3 = vld [vmem:[%s4554_s1 + $0x528] sm:$0xff]  ;;  %v733_v7 = vld [vmem:[%s4554_s1 + $0x520] sm:$0xff] }
  0x9a   :  { %1424 = vmatpush2.msra.mxu0 %v743_v8  ;;  %1636 = vmatprep.subr.mxu1 %v810_v13  ;;  %v800_v8 = vld [vmem:[%s4554_s1 + $0x738] sm:$0xff]  ;;  %v257_v13 = vld [vmem:[%s4555_s2 + $0x790] sm:$0xff] }
  0x9b   :  { %1129 = vmatprep.mubr.f32.mxu0 %v520_v9  ;;  %1637 = vmatpush2.msra.mxu1 %v809_v17  ;;  %v732_v9 = vld [vmem:[%s4554_s1 + $0x518] sm:$0xff]  ;;  %v562_v17 = vmul.f32 %v2603_v10, %v258_v5  ;;  %v561_v10 = vmul.f32 %v2620_v15, %v257_v13  ;;  %v19_v15 = vld [vmem:[%s4555_s2 + $0x20] sm:$0xff] }
  0x9c   :  { %1344 = vmatprep.mubr.f32.mxu1 %v522_v16  ;;  %1425 = vmatprep.subr.mxu0 %v742_v19  ;;  %v799_v16 = vld [vmem:[%s4554_s1 + $0x730] sm:$0xff]  ;;  %v797_v19 = vld [vmem:[%s4554_s1 + $0x720] sm:$0xff]  ;;  %v323_v34 = vmul.f32 %v2534_v49, %v19_v15 }
  0x9d   :  { %1638 = vmatprep.subr.mxu1 %v808_v20  ;;  %1130 = vmatmul.mubr.f32.gmra.mxu0 %v519_v21  ;;  %v559_v20 = vmul.f32 %v2617_v14, %v255_v12  ;;  %v20_v21 = vld [vmem:[%s4555_s2 + $0x28] sm:$0xff] }
  0x9e   :  { %1345 = vmatmul.mubr.f32.gmra.mxu1 %v521_v22  ;;  %1426 = vmatpush2.msra.mxu0 %v741_v25  ;;  %v796_v22 = vld [vmem:[%s4554_s1 + $0x718] sm:$0xff]  ;;  %v730_v14 = vld [vmem:[%s4554_s1 + $0x508] sm:$0xff]  ;;  %v795_v25 = vld [vmem:[%s4554_s1 + $0x710] sm:$0xff] }
  0x9f   :  { %1639 = vmatpush2.msra.mxu1 %v807_v26  ;;  %1427 = vmatprep.subr.mxu0 %v740_v30  ;;  %v729_v26 = vld [vmem:[%s4554_s1 + $0x500] sm:$0xff]  ;;  %v794_v30 = vld [vmem:[%s4554_s1 + $0x708] sm:$0xff] }
  0xa0   :  { %1135 = vmatprep.mubr.f32.mxu0 %v530_v27  ;;  %1350 = vmatprep.mubr.f32.mxu1 %v532_v31  ;;  %v324_v27 = vmul.f32 %v2514_v41, %v20_v21  ;;  %v326_v31 = vmul.f32 %v2524_v45, %v22_v23 }
  0xa1   :  { %1428 = vmatpush2.msra.mxu0 %v739_v32  ;;  %1640 = vmatprep.subr.mxu1 %v806_v35  ;;  %v32_v32 = vld [vmem:[%s4555_s2 + $0x88] sm:$0xff]  ;;  %v325_v35 = vmul.f32 %v2543_v52, %v21_v24 }
  0xa2   :  { %1136 = vmatmul.mubr.f32.gmra.mxu0 %v529_v33  ;;  %1351 = vmatmul.mubr.f32.gmra.mxu1 %v531_v36  ;;  %v793_v33 = vld [vmem:[%s4554_s1 + $0x700] sm:$0xff]  ;;  %v334_v36 = vmul.f32 %v2514_v41, %v30_v28  ;;  %v336_v40 = vmul.f32 %v2524_v45, %v32_v32 }
  0xa3   :  { %1429 = vmatprep.subr.mxu0 %v738_v38  ;;  %1641 = vmatpush2.msra.mxu1 %v805_v42  ;;  %v31_v38 = vld [vmem:[%s4555_s2 + $0x80] sm:$0xff] }
  0xa4   :  { %1430 = vmatpush2.msra.mxu0 %v737_v43  ;;  %1642 = vmatprep.subr.mxu1 %v804_v46 }
  0xa5   :  { %1141 = vmatprep.mubr.f32.mxu0 %v540_v44  ;;  %1356 = vmatprep.mubr.f32.mxu1 %v542_v47 }
  0xa6   :  { %1643 = vmatpush2.msra.mxu1 %v803_v48  ;;  %1142 = vmatmul.mubr.f32.gmra.mxu0 %v539_v50 }
  0xa7   :  { %1357 = vmatmul.mubr.f32.gmra.mxu1 %v541_v51  ;;  %1431 = vmatprep.subr.mxu0 %v736_v56 }
  0xa8   :  { %1644 = vmatprep.subr.mxu1 %v802_v58  ;;  %1432 = vmatpush2.msra.mxu0 %v735_v60 }
  0xa9   :  { %1645 = vmatpush2.msra.mxu1 %v801_v61  ;;  %1147 = vmatprep.mubr.f32.mxu0 %v550_v62 }
  0xaa   :  { %1362 = vmatprep.mubr.f32.mxu1 %v552_v0  ;;  %1433 = vmatprep.subr.mxu0 %v734_v3 }
  0xab   :  { %1148 = vmatmul.mubr.f32.gmra.mxu0 %v549_v1  ;;  %1363 = vmatmul.mubr.f32.gmra.mxu1 %v551_v4 }
  0xac   :  { %1434 = vmatpush2.msra.mxu0 %v733_v7  ;;  %1646 = vmatprep.subr.mxu1 %v800_v8 }
  0xad   :  { %1435 = vmatprep.subr.mxu0 %v732_v9  ;;  %1647 = vmatpush2.msra.mxu1 %v799_v16 }
  0xae   :  { %1153 = vmatprep.mubr.f32.mxu0 %v560_v11  ;;  %1648 = vmatprep.subr.mxu1 %v798_v6 }
  0xaf   :  { %1368 = vmatprep.mubr.f32.mxu1 %v562_v17  ;;  %1436 = vmatpush2.msra.mxu0 %v731_v18 }
  0xb0   :  { %1649 = vmatpush2.msra.mxu1 %v797_v19  ;;  %1154 = vmatmul.mubr.f32.gmra.mxu0 %v559_v20 }
  0xb1   :  { %1369 = vmatmul.mubr.f32.gmra.mxu1 %v561_v10  ;;  %1650 = vmatprep.subr.mxu1 %v796_v22 }
  0xb2   :  { %1437 = vmatprep.subr.mxu0 %v730_v14  ;;  %1651 = vmatpush2.msra.mxu1 %v795_v25 }
  0xb3   :  { %1438 = vmatpush2.msra.mxu0 %v729_v26  ;;  %1652 = vmatprep.subr.mxu1 %v794_v30 }
  0xb4   :  { %1439 = vmatprep.mubr.f32.mxu0 %v324_v27 }
  0xb5   :  { %8 = vsyncpa [#allocation3], 0  ;;  %1653 = vmatpush2.msra.mxu1 %v793_v33  ;;  %1654 = vmatprep.mubr.f32.mxu1 %v326_v31  ;;  %v855_v42 = vld [vmem:[%s4554_s1 + $0x8f0] sm:$0xff]  ;;  %v40_v43 = vld [vmem:[%s4555_s2 + $0xc8] sm:$0xff]  ;;  %v333_v46 = vmul.f32 %v2534_v49, %v29_v37  ;;  %v335_v47 = vmul.f32 %v2543_v52, %v31_v38  ;;  %vm869_vm0 = vcmask 392192   ;;  %vm2021_vm1 = vcmask 556032  }
  0xb6   :  { %v42_v44 = vld [vmem:[%s4555_s2 + $0xd8] sm:$0xff]  ;;  %1440 = vmatmul.mubr.f32.vlgmr.msra.gmra.mxu0 %v323_v34  ;;  %1655 = vmatmul.mubr.f32.vlgmr.msra.gmra.mxu1 %v325_v35  ;;  %v854_v48 = vld [vmem:[%s4554_s1 + $0x8e8] sm:$0xff]  ;;  %v39_v50 = vld [vmem:[%s4555_s2 + $0xc0] sm:$0xff]  ;;  %v344_v54 = vmul.f32 %v2514_v41, %v40_v43 }
  0xb7   :  { %1805 = vmatprep.subr.mxu0 %v856_v39  ;;  %1445 = vmatprep.mubr.f32.mxu0 %v334_v36  ;;  %v41_v51 = vld [vmem:[%s4555_s2 + $0xd0] sm:$0xff]  ;;  %v853_v53 = vld [vmem:[%s4554_s1 + $0x8e0] sm:$0xff]  ;;  %v346_v55 = vmul.f32 %v2524_v45, %v42_v44  ;;  %v50_v56 = vld [vmem:[%s4555_s2 + $0x118] sm:$0xff]  ;;  %v343_v59 = vmul.f32 %v2534_v49, %v39_v50 }
  0xb8   :  { %1806 = vmatpush1.msra.mxu0 %v855_v42  ;;  %1660 = vmatprep.mubr.f32.mxu1 %v336_v40  ;;  %v52_v58 = vld [vmem:[%s4555_s2 + $0x128] sm:$0xff]  ;;  %v345_v60 = vmul.f32 %v2543_v52, %v41_v51  ;;  %v852_v61 = vld [vmem:[%s4554_s1 + $0x8d8] sm:$0xff]  ;;  %v354_v62 = vmul.f32 %v2514_v41, %v50_v56  ;;  %v49_v0 = vld [vmem:[%s4555_s2 + $0x110] sm:$0xff] }
  0xb9   :  { %2112 = vmatprep.subr.mxu1 %v856_v39  ;;  %1807 = vmatprep.subr.mxu0 %v854_v48  ;;  %v51_v1 = vld [vmem:[%s4555_s2 + $0x120] sm:$0xff]  ;;  %v356_v2 = vmul.f32 %v2524_v45, %v52_v58  ;;  %v60_v3 = vld [vmem:[%s4555_s2 + $0x168] sm:$0xff]  ;;  %v62_v4 = vld [vmem:[%s4555_s2 + $0x178] sm:$0xff]  ;;  %v353_v7 = vmul.f32 %v2534_v49, %v49_v0 }
  0xba   :  { %1446 = vmatmul.mubr.f32.gmra.mxu0 %v333_v46  ;;  %1661 = vmatmul.mubr.f32.gmra.mxu1 %v335_v47  ;;  %v851_v5 = vld [vmem:[%s4554_s1 + $0x8d0] sm:$0xff]  ;;  %v355_v8 = vmul.f32 %v2543_v52, %v51_v1  ;;  %v850_v9 = vld [vmem:[%s4554_s1 + $0x8c8] sm:$0xff]  ;;  %v364_v11 = vmul.f32 %v2514_v41, %v60_v3  ;;  %v366_v12 = vmul.f32 %v2524_v45, %v62_v4  ;;  %v59_v13 = vld [vmem:[%s4555_s2 + $0x160] sm:$0xff] }
  0xbb   :  { %2134 = vmatpush1.msra.mxu1 %v855_v42  ;;  %1808 = vmatpush1.msra.mxu0 %v853_v53  ;;  %v61_v16 = vld [vmem:[%s4555_s2 + $0x170] sm:$0xff]  ;;  %v70_v17 = vld [vmem:[%s4555_s2 + $0x1b8] sm:$0xff]  ;;  %v72_v6 = vld [vmem:[%s4555_s2 + $0x1c8] sm:$0xff]  ;;  %v363_v19 = vmul.f32 %v2534_v49, %v59_v13 }
  0xbc   :  { %1451 = vmatprep.mubr.f32.mxu0 %v344_v54  ;;  %1666 = vmatprep.mubr.f32.mxu1 %v346_v55  ;;  %v849_v18 = vld [vmem:[%s4554_s1 + $0x8c0] sm:$0xff]  ;;  %v365_v20 = vmul.f32 %v2543_v52, %v61_v16  ;;  %v848_v10 = vld [vmem:[%s4554_s1 + $0x8b8] sm:$0xff]  ;;  %v374_v21 = vmul.f32 %v2514_v41, %v70_v17  ;;  %v376_v22 = vmul.f32 %v2524_v45, %v72_v6  ;;  %v69_v23 = vld [vmem:[%s4555_s2 + $0x1b0] sm:$0xff] }
  0xbd   :  { %2113 = vmatprep.subr.mxu1 %v854_v48  ;;  %1809 = vmatprep.subr.mxu0 %v852_v61  ;;  %v71_v14 = vld [vmem:[%s4555_s2 + $0x1c0] sm:$0xff]  ;;  %v80_v15 = vld [vmem:[%s4555_s2 + $0x208] sm:$0xff]  ;;  %v82_v24 = vld [vmem:[%s4555_s2 + $0x218] sm:$0xff]  ;;  %v373_v26 = vmul.f32 %v2534_v49, %v69_v23 }
  0xbe   :  { %1452 = vmatmul.mubr.f32.gmra.mxu0 %v343_v59  ;;  %1667 = vmatmul.mubr.f32.gmra.mxu1 %v345_v60  ;;  %v847_v25 = vld [vmem:[%s4554_s1 + $0x8b0] sm:$0xff]  ;;  %v375_v27 = vmul.f32 %v2543_v52, %v71_v14  ;;  %v846_v28 = vld [vmem:[%s4554_s1 + $0x8a8] sm:$0xff]  ;;  %v384_v30 = vmul.f32 %v2514_v41, %v80_v15  ;;  %v386_v31 = vmul.f32 %v2524_v45, %v82_v24  ;;  %v79_v32 = vld [vmem:[%s4555_s2 + $0x200] sm:$0xff] }
  0xbf   :  { %2135 = vmatpush1.msra.mxu1 %v853_v53  ;;  %1457 = vmatprep.mubr.f32.mxu0 %v354_v62  ;;  %v81_v33 = vld [vmem:[%s4555_s2 + $0x210] sm:$0xff]  ;;  %v90_v34 = vld [vmem:[%s4555_s2 + $0x258] sm:$0xff]  ;;  %v92_v35 = vld [vmem:[%s4555_s2 + $0x268] sm:$0xff]  ;;  %v383_v37 = vmul.f32 %v2534_v49, %v79_v32 }
  0xc0   :  { %1672 = vmatprep.mubr.f32.mxu1 %v356_v2  ;;  %1810 = vmatpush1.msra.mxu0 %v851_v5  ;;  %v845_v36 = vld [vmem:[%s4554_s1 + $0x8a0] sm:$0xff]  ;;  %v385_v38 = vmul.f32 %v2543_v52, %v81_v33  ;;  %v844_v39 = vld [vmem:[%s4554_s1 + $0x898] sm:$0xff]  ;;  %v394_v40 = vmul.f32 %v2514_v41, %v90_v34  ;;  %v396_v42 = vmul.f32 %v2524_v45, %v92_v35  ;;  %v89_v43 = vld [vmem:[%s4555_s2 + $0x250] sm:$0xff] }
  0xc1   :  { %2114 = vmatprep.subr.mxu1 %v852_v61  ;;  %1811 = vmatprep.subr.mxu0 %v850_v9  ;;  %v91_v44 = vld [vmem:[%s4555_s2 + $0x260] sm:$0xff]  ;;  %v100_v46 = vld [vmem:[%s4555_s2 + $0x2a8] sm:$0xff]  ;;  %v102_v47 = vld [vmem:[%s4555_s2 + $0x2b8] sm:$0xff]  ;;  %v393_v50 = vmul.f32 %v2534_v49, %v89_v43 }
  0xc2   :  { %1458 = vmatmul.mubr.f32.gmra.mxu0 %v353_v7  ;;  %1673 = vmatmul.mubr.f32.gmra.mxu1 %v355_v8  ;;  %v843_v48 = vld [vmem:[%s4554_s1 + $0x890] sm:$0xff]  ;;  %v395_v51 = vmul.f32 %v2543_v52, %v91_v44  ;;  %v842_v53 = vld [vmem:[%s4554_s1 + $0x888] sm:$0xff]  ;;  %v404_v54 = vmul.f32 %v2514_v41, %v100_v46  ;;  %v406_v55 = vmul.f32 %v2524_v45, %v102_v47  ;;  %v99_v56 = vld [vmem:[%s4555_s2 + $0x2a0] sm:$0xff] }
  0xc3   :  { %1463 = vmatprep.mubr.f32.mxu0 %v364_v11  ;;  %1678 = vmatprep.mubr.f32.mxu1 %v366_v12  ;;  %v101_v58 = vld [vmem:[%s4555_s2 + $0x2b0] sm:$0xff]  ;;  %v110_v59 = vld [vmem:[%s4555_s2 + $0x2f8] sm:$0xff]  ;;  %v112_v60 = vld [vmem:[%s4555_s2 + $0x308] sm:$0xff]  ;;  %v403_v62 = vmul.f32 %v2534_v49, %v99_v56 }
  0xc4   :  { %2136 = vmatpush1.msra.mxu1 %v851_v5  ;;  %1812 = vmatpush1.msra.mxu0 %v849_v18  ;;  %v841_v61 = vld [vmem:[%s4554_s1 + $0x880] sm:$0xff]  ;;  %v405_v0 = vmul.f32 %v2543_v52, %v101_v58  ;;  %v840_v1 = vld [vmem:[%s4554_s1 + $0x878] sm:$0xff]  ;;  %v414_v2 = vmul.f32 %v2514_v41, %v110_v59  ;;  %v416_v3 = vmul.f32 %v2524_v45, %v112_v60  ;;  %v109_v4 = vld [vmem:[%s4555_s2 + $0x2f0] sm:$0xff] }
  0xc5   :  { %2115 = vmatprep.subr.mxu1 %v850_v9  ;;  %1813 = vmatprep.subr.mxu0 %v848_v10  ;;  %v111_v5 = vld [vmem:[%s4555_s2 + $0x300] sm:$0xff]  ;;  %v120_v7 = vld [vmem:[%s4555_s2 + $0x348] sm:$0xff]  ;;  %v122_v8 = vld [vmem:[%s4555_s2 + $0x358] sm:$0xff]  ;;  %v413_v11 = vmul.f32 %v2534_v49, %v109_v4 }
  0xc6   :  { %1464 = vmatmul.mubr.f32.gmra.mxu0 %v363_v19  ;;  %1679 = vmatmul.mubr.f32.gmra.mxu1 %v365_v20  ;;  %v839_v9 = vld [vmem:[%s4554_s1 + $0x870] sm:$0xff]  ;;  %v415_v12 = vmul.f32 %v2543_v52, %v111_v5  ;;  %v838_v13 = vld [vmem:[%s4554_s1 + $0x868] sm:$0xff]  ;;  %v424_v16 = vmul.f32 %v2514_v41, %v120_v7  ;;  %v426_v17 = vmul.f32 %v2524_v45, %v122_v8  ;;  %v119_v6 = vld [vmem:[%s4555_s2 + $0x340] sm:$0xff] }
  0xc7   :  { %1469 = vmatprep.mubr.f32.mxu0 %v374_v21  ;;  %1684 = vmatprep.mubr.f32.mxu1 %v376_v22  ;;  %v130_v19 = vld [vmem:[%s4555_s2 + $0x398] sm:$0xff]  ;;  %v132_v20 = vld [vmem:[%s4555_s2 + $0x3a8] sm:$0xff]  ;;  %v423_v21 = vmul.f32 %v2534_v49, %v119_v6  ;;  %v129_v24 = vld [vmem:[%s4555_s2 + $0x390] sm:$0xff] }
  0xc8   :  { %2137 = vmatpush1.msra.mxu1 %v849_v18  ;;  %1814 = vmatpush1.msra.mxu0 %v847_v25  ;;  %v121_v18 = vld [vmem:[%s4555_s2 + $0x350] sm:$0xff]  ;;  %v836_v23 = vld [vmem:[%s4554_s1 + $0x858] sm:$0xff]  ;;  %v434_v14 = vmul.f32 %v2514_v41, %v130_v19  ;;  %v436_v15 = vmul.f32 %v2524_v45, %v132_v20  ;;  %v834_v32 = vld [vmem:[%s4554_s1 + $0x848] sm:$0xff] }
  0xc9   :  { %2116 = vmatprep.subr.mxu1 %v848_v10  ;;  %1815 = vmatprep.subr.mxu0 %v846_v28  ;;  %v837_v10 = vld [vmem:[%s4554_s1 + $0x860] sm:$0xff]  ;;  %v425_v22 = vmul.f32 %v2543_v52, %v121_v18  ;;  %v832_v43 = vld [vmem:[%s4554_s1 + $0x838] sm:$0xff]  ;;  %v149_v47 = vld [vmem:[%s4555_s2 + $0x430] sm:$0xff] }
  0xca   :  { %1470 = vmatmul.mubr.f32.gmra.mxu0 %v373_v26  ;;  %1685 = vmatmul.mubr.f32.gmra.mxu1 %v375_v27  ;;  %v140_v26 = vld [vmem:[%s4555_s2 + $0x3e8] sm:$0xff]  ;;  %v142_v27 = vld [vmem:[%s4555_s2 + $0x3f8] sm:$0xff]  ;;  %v139_v35 = vld [vmem:[%s4555_s2 + $0x3e0] sm:$0xff] }
  0xcb   :  { %1475 = vmatprep.mubr.f32.mxu0 %v384_v30  ;;  %1690 = vmatprep.mubr.f32.mxu1 %v386_v31  ;;  %v433_v30 = vmul.f32 %v2534_v49, %v129_v24  ;;  %v444_v33 = vmul.f32 %v2514_v41, %v140_v26  ;;  %v446_v34 = vmul.f32 %v2524_v45, %v142_v27  ;;  %v830_v56 = vld [vmem:[%s4554_s1 + $0x828] sm:$0xff]  ;;  %v159_v60 = vld [vmem:[%s4555_s2 + $0x480] sm:$0xff]  ;;  %v828_v4 = vld [vmem:[%s4554_s1 + $0x818] sm:$0xff] }
  0xcc   :  { %2138 = vmatpush1.msra.mxu1 %v847_v25  ;;  %1816 = vmatpush1.msra.mxu0 %v845_v36  ;;  %v131_v25 = vld [vmem:[%s4555_s2 + $0x3a0] sm:$0xff]  ;;  %v169_v8 = vld [vmem:[%s4555_s2 + $0x4d0] sm:$0xff]  ;;  %v826_v6 = vld [vmem:[%s4554_s1 + $0x808] sm:$0xff] }
  0xcd   :  { %2117 = vmatprep.subr.mxu1 %v846_v28  ;;  %1817 = vmatprep.subr.mxu0 %v844_v39  ;;  %v835_v28 = vld [vmem:[%s4554_s1 + $0x850] sm:$0xff]  ;;  %v435_v31 = vmul.f32 %v2543_v52, %v131_v25  ;;  %v179_v20 = vld [vmem:[%s4555_s2 + $0x520] sm:$0xff]  ;;  %v868_v24 = vld [vmem:[%s4554_s1 + $0x958] sm:$0xff] }
  0xce   :  { %1476 = vmatmul.mubr.f32.gmra.mxu0 %v383_v37  ;;  %1691 = vmatmul.mubr.f32.gmra.mxu1 %v385_v38  ;;  %v150_v37 = vld [vmem:[%s4555_s2 + $0x438] sm:$0xff]  ;;  %v152_v38 = vld [vmem:[%s4555_s2 + $0x448] sm:$0xff]  ;;  %v189_v27 = vld [vmem:[%s4555_s2 + $0x570] sm:$0xff] }
  0xcf   :  { %1481 = vmatprep.mubr.f32.mxu0 %v394_v40  ;;  %1696 = vmatprep.mubr.f32.mxu1 %v396_v42  ;;  %v443_v40 = vmul.f32 %v2534_v49, %v139_v35  ;;  %v454_v44 = vmul.f32 %v2514_v41, %v150_v37  ;;  %v456_v46 = vmul.f32 %v2524_v45, %v152_v38  ;;  %v866_v35 = vld [vmem:[%s4554_s1 + $0x948] sm:$0xff]  ;;  %v199_v38 = vld [vmem:[%s4555_s2 + $0x5c0] sm:$0xff] }
  0xd0   :  { %2139 = vmatpush1.msra.mxu1 %v845_v36  ;;  %1818 = vmatpush1.msra.mxu0 %v843_v48  ;;  %v141_v36 = vld [vmem:[%s4555_s2 + $0x3f0] sm:$0xff]  ;;  %v23_v29 = vld [vmem:[%s4555_s2 + $0x40] sm:$0xff] }
  0xd1   :  { %2118 = vmatprep.subr.mxu1 %v844_v39  ;;  %1819 = vmatprep.subr.mxu0 %v842_v53  ;;  %v833_v39 = vld [vmem:[%s4554_s1 + $0x840] sm:$0xff]  ;;  %v445_v42 = vmul.f32 %v2543_v52, %v141_v36 }
  0xd2   :  { %1482 = vmatmul.mubr.f32.gmra.mxu0 %v393_v50  ;;  %1697 = vmatmul.mubr.f32.gmra.mxu1 %v395_v51  ;;  %v160_v50 = vld [vmem:[%s4555_s2 + $0x488] sm:$0xff]  ;;  %v162_v51 = vld [vmem:[%s4555_s2 + $0x498] sm:$0xff] }
  0xd3   :  { %1487 = vmatprep.mubr.f32.mxu0 %v404_v54  ;;  %1702 = vmatprep.mubr.f32.mxu1 %v406_v55  ;;  %v453_v54 = vmul.f32 %v2534_v49, %v149_v47  ;;  %v464_v58 = vmul.f32 %v2514_v41, %v160_v50  ;;  %v466_v59 = vmul.f32 %v2524_v45, %v162_v51  ;;  %v864_v47 = vld [vmem:[%s4554_s1 + $0x938] sm:$0xff]  ;;  %v209_v51 = vld [vmem:[%s4555_s2 + $0x610] sm:$0xff] }
  0xd4   :  { %2140 = vmatpush1.msra.mxu1 %v843_v48  ;;  %1820 = vmatpush1.msra.mxu0 %v841_v61  ;;  %v151_v48 = vld [vmem:[%s4555_s2 + $0x440] sm:$0xff] }
  0xd5   :  { %2119 = vmatprep.subr.mxu1 %v842_v53  ;;  %1821 = vmatprep.subr.mxu0 %v840_v1  ;;  %v831_v53 = vld [vmem:[%s4554_s1 + $0x830] sm:$0xff]  ;;  %v455_v55 = vmul.f32 %v2543_v52, %v151_v48 }
  0xd6   :  { %1488 = vmatmul.mubr.f32.gmra.mxu0 %v403_v62  ;;  %1703 = vmatmul.mubr.f32.gmra.mxu1 %v405_v0  ;;  %v170_v62 = vld [vmem:[%s4555_s2 + $0x4d8] sm:$0xff]  ;;  %v172_v0 = vld [vmem:[%s4555_s2 + $0x4e8] sm:$0xff] }
  0xd7   :  { %1493 = vmatprep.mubr.f32.mxu0 %v414_v2  ;;  %1708 = vmatprep.mubr.f32.mxu1 %v416_v3  ;;  %v463_v2 = vmul.f32 %v2534_v49, %v159_v60  ;;  %v474_v5 = vmul.f32 %v2514_v41, %v170_v62  ;;  %v476_v7 = vmul.f32 %v2524_v45, %v172_v0  ;;  %v862_v60 = vld [vmem:[%s4554_s1 + $0x928] sm:$0xff]  ;;  %v219_v0 = vld [vmem:[%s4555_s2 + $0x660] sm:$0xff] }
  0xd8   :  { %2141 = vmatpush1.msra.mxu1 %v841_v61  ;;  %1822 = vmatpush1.msra.mxu0 %v839_v9  ;;  %v161_v61 = vld [vmem:[%s4555_s2 + $0x490] sm:$0xff] }
  0xd9   :  { %2120 = vmatprep.subr.mxu1 %v840_v1  ;;  %1823 = vmatprep.subr.mxu0 %v838_v13  ;;  %v829_v1 = vld [vmem:[%s4554_s1 + $0x820] sm:$0xff]  ;;  %v465_v3 = vmul.f32 %v2543_v52, %v161_v61 }
  0xda   :  { %1494 = vmatmul.mubr.f32.gmra.mxu0 %v413_v11  ;;  %1709 = vmatmul.mubr.f32.gmra.mxu1 %v415_v12  ;;  %v180_v11 = vld [vmem:[%s4555_s2 + $0x528] sm:$0xff]  ;;  %v182_v12 = vld [vmem:[%s4555_s2 + $0x538] sm:$0xff] }
  0xdb   :  { %1499 = vmatprep.mubr.f32.mxu0 %v424_v16  ;;  %1714 = vmatprep.mubr.f32.mxu1 %v426_v17  ;;  %v473_v16 = vmul.f32 %v2534_v49, %v169_v8  ;;  %v484_v18 = vmul.f32 %v2514_v41, %v180_v11  ;;  %v486_v19 = vmul.f32 %v2524_v45, %v182_v12  ;;  %v860_v8 = vld [vmem:[%s4554_s1 + $0x918] sm:$0xff]  ;;  %v229_v12 = vld [vmem:[%s4555_s2 + $0x6b0] sm:$0xff] }
  0xdc   :  { %2142 = vmatpush1.msra.mxu1 %v839_v9  ;;  %1824 = vmatpush1.msra.mxu0 %v837_v10  ;;  %v171_v9 = vld [vmem:[%s4555_s2 + $0x4e0] sm:$0xff] }
  0xdd   :  { %2121 = vmatprep.subr.mxu1 %v838_v13  ;;  %1825 = vmatprep.subr.mxu0 %v836_v23  ;;  %v827_v13 = vld [vmem:[%s4554_s1 + $0x810] sm:$0xff]  ;;  %v475_v17 = vmul.f32 %v2543_v52, %v171_v9 }
  0xde   :  { %1500 = vmatmul.mubr.f32.gmra.mxu0 %v423_v21  ;;  %1715 = vmatmul.mubr.f32.gmra.mxu1 %v425_v22  ;;  %v190_v21 = vld [vmem:[%s4555_s2 + $0x578] sm:$0xff]  ;;  %v192_v22 = vld [vmem:[%s4555_s2 + $0x588] sm:$0xff] }
  0xdf   :  { %1505 = vmatprep.mubr.f32.mxu0 %v434_v14  ;;  %1720 = vmatprep.mubr.f32.mxu1 %v436_v15  ;;  %v483_v14 = vmul.f32 %v2534_v49, %v179_v20  ;;  %v494_v25 = vmul.f32 %v2514_v41, %v190_v21  ;;  %v496_v26 = vmul.f32 %v2524_v45, %v192_v22  ;;  %v859_v20 = vld [vmem:[%s4554_s1 + $0x910] sm:$0xff] }
  0xe0   :  { %2143 = vmatpush1.msra.mxu1 %v837_v10  ;;  %1826 = vmatpush1.msra.mxu0 %v835_v28  ;;  %v181_v10 = vld [vmem:[%s4555_s2 + $0x530] sm:$0xff] }
  0xe1   :  { %2122 = vmatprep.subr.mxu1 %v836_v23  ;;  %1827 = vmatprep.subr.mxu0 %v834_v32  ;;  %v825_v23 = vld [vmem:[%s4554_s1 + $0x800] sm:$0xff]  ;;  %v485_v15 = vmul.f32 %v2543_v52, %v181_v10  ;;  %v533_v10 = vmul.f32 %v2534_v49, %v229_v12  ;;  %v164_v12 = vld [vmem:[%s4555_s2 + $0x4a8] sm:$0xff] }
  0xe2   :  { %1506 = vmatmul.mubr.f32.gmra.mxu0 %v433_v30  ;;  %1721 = vmatmul.mubr.f32.gmra.mxu1 %v435_v31  ;;  %v200_v30 = vld [vmem:[%s4555_s2 + $0x5c8] sm:$0xff]  ;;  %v202_v31 = vld [vmem:[%s4555_s2 + $0x5d8] sm:$0xff] }
  0xe3   :  { %1511 = vmatprep.mubr.f32.mxu0 %v444_v33  ;;  %1726 = vmatprep.mubr.f32.mxu1 %v446_v34  ;;  %v493_v33 = vmul.f32 %v2534_v49, %v189_v27  ;;  %v504_v36 = vmul.f32 %v2514_v41, %v200_v30  ;;  %v506_v37 = vmul.f32 %v2524_v45, %v202_v31  ;;  %v252_v30 = vld [vmem:[%s4555_s2 + $0x768] sm:$0xff] }
  0xe4   :  { %2144 = vmatpush1.msra.mxu1 %v835_v28  ;;  %1828 = vmatpush1.msra.mxu0 %v833_v39  ;;  %v191_v28 = vld [vmem:[%s4555_s2 + $0x580] sm:$0xff] }
  0xe5   :  { %2123 = vmatprep.subr.mxu1 %v834_v32  ;;  %1829 = vmatprep.subr.mxu0 %v832_v43  ;;  %v867_v32 = vld [vmem:[%s4554_s1 + $0x950] sm:$0xff]  ;;  %v495_v34 = vmul.f32 %v2543_v52, %v191_v28  ;;  %v250_v28 = vld [vmem:[%s4555_s2 + $0x758] sm:$0xff] }
  0xe6   :  { %1512 = vmatmul.mubr.f32.gmra.mxu0 %v443_v40  ;;  %1727 = vmatmul.mubr.f32.gmra.mxu1 %v445_v42  ;;  %v210_v40 = vld [vmem:[%s4555_s2 + $0x618] sm:$0xff]  ;;  %v212_v42 = vld [vmem:[%s4555_s2 + $0x628] sm:$0xff] }
  0xe7   :  { %1517 = vmatprep.mubr.f32.mxu0 %v454_v44  ;;  %1732 = vmatprep.mubr.f32.mxu1 %v456_v46  ;;  %v503_v44 = vmul.f32 %v2534_v49, %v199_v38  ;;  %v514_v48 = vmul.f32 %v2514_v41, %v210_v40  ;;  %v516_v50 = vmul.f32 %v2524_v45, %v212_v42 }
  0xe8   :  { %2145 = vmatpush1.msra.mxu1 %v833_v39  ;;  %1830 = vmatpush1.msra.mxu0 %v831_v53  ;;  %v201_v39 = vld [vmem:[%s4555_s2 + $0x5d0] sm:$0xff]  ;;  %v554_v40 = vmul.f32 %v2514_v41, %v250_v28  ;;  %v556_v42 = vmul.f32 %v2524_v45, %v252_v30 }
  0xe9   :  { %2124 = vmatprep.subr.mxu1 %v832_v43  ;;  %1831 = vmatprep.subr.mxu0 %v830_v56  ;;  %v865_v43 = vld [vmem:[%s4554_s1 + $0x940] sm:$0xff]  ;;  %v505_v46 = vmul.f32 %v2543_v52, %v201_v39  ;;  %v266_v39 = vld [vmem:[%s4553_s0 + $0x8] sm:$0x3] }
  0xea   :  { %1518 = vmatmul.mubr.f32.gmra.mxu0 %v453_v54  ;;  %1733 = vmatmul.mubr.f32.gmra.mxu1 %v455_v55  ;;  %v220_v54 = vld [vmem:[%s4555_s2 + $0x668] sm:$0xff]  ;;  %v222_v55 = vld [vmem:[%s4555_s2 + $0x678] sm:$0xff] }
  0xeb   :  { %1523 = vmatprep.mubr.f32.mxu0 %v464_v58  ;;  %1738 = vmatprep.mubr.f32.mxu1 %v466_v59  ;;  %v513_v58 = vmul.f32 %v2534_v49, %v209_v51  ;;  %v524_v61 = vmul.f32 %v2514_v41, %v220_v54  ;;  %v526_v62 = vmul.f32 %v2524_v45, %v222_v55 }
  0xec   :  { %2146 = vmatpush1.msra.mxu1 %v831_v53  ;;  %1832 = vmatpush1.msra.mxu0 %v829_v1  ;;  %v211_v53 = vld [vmem:[%s4555_s2 + $0x620] sm:$0xff]  ;;  %v3950_v54 = vrot.slane %v266_v39, %v275_v57  ;;  %v261_v57 = vld [vmem:[%s4555_s2 + $0x7b0] sm:$0xff] }
  0xed   :  { %2125 = vmatprep.subr.mxu1 %v830_v56  ;;  %1833 = vmatprep.subr.mxu0 %v828_v4  ;;  %v863_v56 = vld [vmem:[%s4554_s1 + $0x930] sm:$0xff]  ;;  %v515_v59 = vmul.f32 %v2543_v52, %v211_v53 }
  0xee   :  { %1524 = vmatmul.mubr.f32.gmra.mxu0 %v463_v2  ;;  %1739 = vmatmul.mubr.f32.gmra.mxu1 %v465_v3  ;;  %v230_v2 = vld [vmem:[%s4555_s2 + $0x6b8] sm:$0xff]  ;;  %v232_v3 = vld [vmem:[%s4555_s2 + $0x6c8] sm:$0xff] }
  0xef   :  { %1529 = vmatprep.mubr.f32.mxu0 %v474_v5  ;;  %1744 = vmatprep.mubr.f32.mxu1 %v476_v7  ;;  %v523_v5 = vmul.f32 %v2534_v49, %v219_v0  ;;  %v534_v9 = vmul.f32 %v2514_v41, %v230_v2  ;;  %v536_v11 = vmul.f32 %v2524_v45, %v232_v3 }
  0xf0   :  { %2147 = vmatpush1.msra.mxu1 %v829_v1  ;;  %1834 = vmatpush1.msra.mxu0 %v827_v13  ;;  %v221_v1 = vld [vmem:[%s4555_s2 + $0x670] sm:$0xff]  ;;  %v3972_v2 = vrot.slane %v266_v39, %v271_v63 }
  0xf1   :  { %2126 = vmatprep.subr.mxu1 %v828_v4  ;;  %1835 = vmatprep.subr.mxu0 %v826_v6  ;;  %v861_v4 = vld [vmem:[%s4554_s1 + $0x920] sm:$0xff]  ;;  %v525_v7 = vmul.f32 %v2543_v52, %v221_v1  ;;  %v24_v1 = vld [vmem:[%s4555_s2 + $0x48] sm:$0xff]  ;;  %v153_v63 = vld [vmem:[%s4555_s2 + $0x450] sm:$0xff] }
  0xf2   :  { %1530 = vmatmul.mubr.f32.gmra.mxu0 %v473_v16  ;;  %1745 = vmatmul.mubr.f32.gmra.mxu1 %v475_v17  ;;  %v240_v16 = vld [vmem:[%s4555_s2 + $0x708] sm:$0xff]  ;;  %v242_v17 = vld [vmem:[%s4555_s2 + $0x718] sm:$0xff] }
  0xf3   :  { %1535 = vmatprep.mubr.f32.mxu0 %v484_v18  ;;  %1750 = vmatprep.mubr.f32.mxu1 %v486_v19 }
  0xf4   :  { %2148 = vmatpush1.msra.mxu1 %v827_v13  ;;  %1836 = vmatpush1.msra.mxu0 %v825_v23  ;;  %v231_v13 = vld [vmem:[%s4555_s2 + $0x6c0] sm:$0xff] }
  0xf5   :  { %2127 = vmatprep.subr.mxu1 %v826_v6  ;;  %1857 = vmatprep.subr.mxu0 %v868_v24  ;;  %v535_v21 = vmul.f32 %v2543_v52, %v231_v13 }
  0xf6   :  { %1536 = vmatmul.mubr.f32.gmra.mxu0 %v483_v14  ;;  %1751 = vmatmul.mubr.f32.gmra.mxu1 %v485_v15  ;;  %v858_v14 = vld [vmem:[%s4554_s1 + $0x908] sm:$0xff]  ;;  %v544_v15 = vmul.f32 %v2514_v41, %v240_v16 }
  0xf7   :  { %1541 = vmatprep.mubr.f32.mxu0 %v494_v25  ;;  %1756 = vmatprep.mubr.f32.mxu1 %v496_v26  ;;  %v239_v25 = vld [vmem:[%s4555_s2 + $0x700] sm:$0xff]  ;;  %v241_v26 = vld [vmem:[%s4555_s2 + $0x710] sm:$0xff] }
  0xf8   :  { %2149 = vmatpush1.msra.mxu1 %v825_v23  ;;  %1858 = vmatpush2.msra.mxu0 %v867_v32 }
  0xf9   :  { %2128 = vmatprep.subr.mxu1 %v868_v24  ;;  %1859 = vmatprep.subr.mxu0 %v866_v35  ;;  %v546_v24 = vmul.f32 %v2524_v45, %v242_v17 }
  0xfa   :  { %1542 = vmatmul.mubr.f32.gmra.mxu0 %v493_v33  ;;  %1757 = vmatmul.mubr.f32.gmra.mxu1 %v495_v34  ;;  %v857_v34 = vld [vmem:[%s4554_s1 + $0x900] sm:$0xff] }
  0xfb   :  { %1547 = vmatprep.mubr.f32.mxu0 %v504_v36  ;;  %1762 = vmatprep.mubr.f32.mxu1 %v506_v37  ;;  %v545_v36 = vmul.f32 %v2543_v52, %v241_v26 }
  0xfc   :  { %2150 = vmatpush2.msra.mxu1 %v867_v32  ;;  %1860 = vmatpush2.msra.mxu0 %v865_v43 }
  0xfd   :  { %2129 = vmatprep.subr.mxu1 %v866_v35  ;;  %1861 = vmatprep.subr.mxu0 %v864_v47  ;;  %v543_v35 = vmul.f32 %v2534_v49, %v239_v25  ;;  %v174_v25 = vld [vmem:[%s4555_s2 + $0x4f8] sm:$0xff] }
  0xfe   :  { %1548 = vmatmul.mubr.f32.gmra.mxu0 %v503_v44  ;;  %1763 = vmatmul.mubr.f32.gmra.mxu1 %v505_v46  ;;  %v251_v44 = vld [vmem:[%s4555_s2 + $0x760] sm:$0xff] }
  0xff   :  { %1553 = vmatprep.mubr.f32.mxu0 %v514_v48  ;;  %1768 = vmatprep.mubr.f32.mxu1 %v516_v50  ;;  %v262_v48 = vld [vmem:[%s4555_s2 + $0x7b8] sm:$0xff] }
 0x100   :  { %2151 = vmatpush2.msra.mxu1 %v865_v43  ;;  %1862 = vmatpush2.msra.mxu0 %v863_v56  ;;  %v249_v43 = vld [vmem:[%s4555_s2 + $0x750] sm:$0xff] }
 0x101   :  { %2130 = vmatprep.subr.mxu1 %v864_v47  ;;  %1863 = vmatprep.subr.mxu0 %v862_v60  ;;  %v260_v47 = vld [vmem:[%s4555_s2 + $0x7a8] sm:$0xff]  ;;  %v553_v55 = vmul.f32 %v2534_v49, %v249_v43 }
 0x102   :  { %1554 = vmatmul.mubr.f32.gmra.mxu0 %v513_v58  ;;  %1769 = vmatmul.mubr.f32.gmra.mxu1 %v515_v59 }
 0x103   :  { %1559 = vmatprep.mubr.f32.mxu0 %v524_v61  ;;  %1774 = vmatprep.mubr.f32.mxu1 %v526_v62  ;;  %v1011_v6 = vpop.f32.mrf.mxu0  ;;  %v566_v61 = vmul.f32 %v2524_v45, %v262_v48  ;;  %v259_v62 = vld [vmem:[%s4555_s2 + $0x7a0] sm:$0xff] }
 0x104   :  { %2152 = vmatpush2.msra.mxu1 %v863_v56  ;;  %1864 = vmatpush2.msra.mxu0 %v861_v4  ;;  %v1226_v18 = vpop.f32.mrf.mxu1  ;;  %v555_v56 = vmul.f32 %v2543_v52, %v251_v44 }
 0x105   :  { %2131 = vmatprep.subr.mxu1 %v862_v60  ;;  %1865 = vmatprep.subr.mxu0 %v860_v8  ;;  %v3894_v19 = vadd.f32 %v1226_v18, %v1011_v6  ;;  %v1013_v22 = vpop.f32.mrf.mxu0  ;;  %v564_v60 = vmul.f32 %v2514_v41, %v260_v47  ;;  %v154_v41 = vld [vmem:[%s4555_s2 + $0x458] sm:$0xff]  ;;  %v327_v6 = vmul.f32 %v3972_v2, %v23_v29 }
 0x106   :  { %1560 = vmatmul.mubr.f32.gmra.mxu0 %v523_v5  ;;  %1775 = vmatmul.mubr.f32.gmra.mxu1 %v525_v7  ;;  %v1228_v23 = vpop.f32.mrf.mxu1  ;;  %v565_v5 = vmul.f32 %v2543_v52, %v261_v57  ;;  %v34_v52 = vld [vmem:[%s4555_s2 + $0x98] sm:$0xff]  ;;  %v457_v18 = vmul.f32 %v3972_v2, %v153_v63 }
 0x107   :  { %1565 = vmatprep.mubr.f32.mxu0 %v534_v9  ;;  %1780 = vmatprep.mubr.f32.mxu1 %v536_v11  ;;  %v3912_v27 = vadd.f32 %v1228_v23, %v1013_v22  ;;  %v1017_v31 = vpop.f32.mrf.mxu0  ;;  %v328_v9 = vmul.f32 %v3950_v54, %v24_v1  ;;  %v458_v11 = vmul.f32 %v3950_v54, %v154_v41  ;;  %v33_v22 = vld [vmem:[%s4555_s2 + $0x90] sm:$0xff]  ;;  %v163_v23 = vld [vmem:[%s4555_s2 + $0x4a0] sm:$0xff]  ;;  %v74_v63 = vld [vmem:[%s4555_s2 + $0x1d8] sm:$0xff] }
 0x108   :  { %2153 = vmatpush2.msra.mxu1 %v861_v4  ;;  %1866 = vmatpush2.msra.mxu0 %v859_v20  ;;  %v1232_v32 = vpop.f32.mrf.mxu1  ;;  %v563_v4 = vmul.f32 %v2534_v49, %v259_v62  ;;  %v337_v30 = vmul.f32 %v3972_v2, %v33_v22  ;;  %v73_v22 = vld [vmem:[%s4555_s2 + $0x1d0] sm:$0xff] }
 0x109   :  { %2132 = vmatprep.subr.mxu1 %v860_v8  ;;  %v3920_v33 = vadd.f32 %v1232_v32, %v1017_v31  ;;  %1867 = vmatprep.subr.mxu0 %v858_v14  ;;  %v1019_v37 = vpop.f32.mrf.mxu0  ;;  %v467_v31 = vmul.f32 %v3972_v2, %v163_v23  ;;  %v203_v23 = vld [vmem:[%s4555_s2 + $0x5e0] sm:$0xff] }
 0x10a   :  { %1566 = vmatmul.mubr.f32.gmra.mxu0 %v533_v10  ;;  %1781 = vmatmul.mubr.f32.gmra.mxu1 %v535_v21  ;;  %v1234_v38 = vpop.f32.mrf.mxu1  ;;  %v338_v10 = vmul.f32 %v3950_v54, %v34_v52  ;;  %v468_v21 = vmul.f32 %v3950_v54, %v164_v12 }
 0x10b   :  { %1571 = vmatprep.mubr.f32.mxu0 %v544_v15  ;;  %1786 = vmatprep.mubr.f32.mxu1 %v546_v24  ;;  %v3938_v46 = vadd.f32 %v1234_v38, %v1019_v37  ;;  %v1023_v50 = vpop.f32.mrf.mxu0  ;;  %v44_v24 = vld [vmem:[%s4555_s2 + $0xe8] sm:$0xff]  ;;  %v173_v37 = vld [vmem:[%s4555_s2 + $0x4f0] sm:$0xff] }
 0x10c   :  { %2154 = vmatpush2.msra.mxu1 %v859_v20  ;;  %1868 = vmatpush2.msra.mxu0 %v857_v34  ;;  %v1238_v51 = vpop.f32.mrf.mxu1  ;;  %v477_v48 = vmul.f32 %v3972_v2, %v173_v37 }
 0x10d   :  { %2133 = vmatprep.subr.mxu1 %v858_v14  ;;  %v3946_v53 = vadd.f32 %v1238_v51, %v1023_v50  ;;  %v1025_v58 = vpop.f32.mrf.mxu0 }
 0x10e   :  { %1572 = vmatmul.mubr.f32.gmra.mxu0 %v543_v35  ;;  %1787 = vmatmul.mubr.f32.gmra.mxu1 %v545_v36  ;;  %v1240_v59 = vpop.f32.mrf.mxu1  ;;  %v478_v35 = vmul.f32 %v3950_v54, %v174_v25  ;;  %v43_v36 = vld [vmem:[%s4555_s2 + $0xe0] sm:$0xff]  ;;  %v214_v25 = vld [vmem:[%s4555_s2 + $0x638] sm:$0xff] }
 0x10f   :  { %1577 = vmatprep.mubr.f32.mxu0 %v554_v40  ;;  %1792 = vmatprep.mubr.f32.mxu1 %v556_v42  ;;  %v3962_v0 = vadd.f32 %v1240_v59, %v1025_v58  ;;  %v54_v40 = vld [vmem:[%s4555_s2 + $0x138] sm:$0xff]  ;;  %v184_v42 = vld [vmem:[%s4555_s2 + $0x548] sm:$0xff]  ;;  %v347_v47 = vmul.f32 %v3972_v2, %v43_v36  ;;  %v183_v58 = vld [vmem:[%s4555_s2 + $0x540] sm:$0xff]  ;;  %v518_v37 = vmul.f32 %v3950_v54, %v214_v25 }
 0x110   :  { %2155 = vmatpush2.msra.mxu1 %v857_v34  ;;  %v1029_v45 = vpop.f32.mrf.mxu0  ;;  %v1244_v3 = vpop.f32.mrf.mxu1  ;;  %v348_v34 = vmul.f32 %v3950_v54, %v44_v24  ;;  %v358_v51 = vmul.f32 %v3950_v54, %v54_v40  ;;  %v84_v24 = vld [vmem:[%s4555_s2 + $0x228] sm:$0xff]  ;;  %v213_v40 = vld [vmem:[%s4555_s2 + $0x630] sm:$0xff] }
 0x111   :  { %v3976_v7 = vadd.f32 %v1244_v3, %v1029_v45  ;;  %v487_v45 = vmul.f32 %v3972_v2, %v183_v58  ;;  %v388_v36 = vmul.f32 %v3950_v54, %v84_v24 }
 0x112   :  { %1578 = vmatmul.mubr.f32.gmra.mxu0 %v553_v55  ;;  %1793 = vmatmul.mubr.f32.gmra.mxu1 %v555_v56  ;;  %v1031_v8 = vpop.f32.mrf.mxu0  ;;  %v1246_v49 = vpop.f32.mrf.mxu1  ;;  %v488_v55 = vmul.f32 %v3950_v54, %v184_v42  ;;  %v53_v56 = vld [vmem:[%s4555_s2 + $0x130] sm:$0xff] }
 0x113   :  { %1583 = vmatprep.mubr.f32.mxu0 %v564_v60  ;;  %1798 = vmatprep.mubr.f32.mxu1 %v566_v61  ;;  %v3992_v13 = vadd.f32 %v1246_v49, %v1031_v8  ;;  %v64_v60 = vld [vmem:[%s4555_s2 + $0x188] sm:$0xff]  ;;  %v194_v61 = vld [vmem:[%s4555_s2 + $0x598] sm:$0xff]  ;;  %v357_v41 = vmul.f32 %v3972_v2, %v53_v56  ;;  %v63_v8 = vld [vmem:[%s4555_s2 + $0x180] sm:$0xff]  ;;  %v517_v56 = vmul.f32 %v3972_v2, %v213_v40 }
 0x114   :  { %v1035_v16 = vpop.f32.mrf.mxu0  ;;  %v204_v49 = vld [vmem:[%s4555_s2 + $0x5e8] sm:$0xff]  ;;  %v254_v40 = vld [vmem:[%s4555_s2 + $0x778] sm:$0xff] }
 0x115   :  { %v1250_v17 = vpop.f32.mrf.mxu1 }
 0x116   :  { %1584 = vmatmul.mubr.f32.gmra.mxu0 %v563_v4  ;;  %1799 = vmatmul.mubr.f32.gmra.mxu1 %v565_v5  ;;  %v3996_v20 = vadd.f32 %v1250_v17, %v1035_v16  ;;  %v1037_v14 = vpop.f32.mrf.mxu0  ;;  %v368_v4 = vmul.f32 %v3950_v54, %v64_v60  ;;  %v498_v5 = vmul.f32 %v3950_v54, %v194_v61  ;;  %v93_v61 = vld [vmem:[%s4555_s2 + $0x270] sm:$0xff] }
 0x117   :  { %2087 = vmatprep.mubr.msk.f32.mxu0 %vm869_vm0, %v328_v9  ;;  %2100 = vmatprep.mubr.msk.f32.mxu1 %vm869_vm0, %v458_v11  ;;  %v1252_v15 = vpop.f32.mrf.mxu1  ;;  %v193_v9 = vld [vmem:[%s4555_s2 + $0x590] sm:$0xff]  ;;  %v367_v17 = vmul.f32 %v3972_v2, %v63_v8  ;;  %v397_v8 = vmul.f32 %v3972_v2, %v93_v61 }
 0x118   :  { %v4014_v26 = vadd.f32 %v1252_v15, %v1037_v14 }
 0x119   :  { %v1041_v28 = vpop.f32.mrf.mxu0  ;;  %v1256_v32 = vpop.f32.mrf.mxu1 }
 0x11a   :  { %1870 = vmatmul.mubr.f32.vlgmr.msra.gmra.mxu0 %v327_v6  ;;  %1948 = vmatmul.mubr.f32.vlgmr.msra.gmra.mxu1 %v457_v18  ;;  %v4028_v38 = vadd.f32 %v1256_v32, %v1041_v28  ;;  %v497_v6 = vmul.f32 %v3972_v2, %v193_v9  ;;  %v377_v32 = vmul.f32 %v3972_v2, %v73_v22 }
 0x11b   :  { %2088 = vmatprep.mubr.msk.f32.mxu0 %vm869_vm0, %v338_v10  ;;  %2101 = vmatprep.mubr.msk.f32.mxu1 %vm869_vm0, %v468_v21  ;;  %v1043_v39 = vpop.f32.mrf.mxu0  ;;  %v1258_v43 = vpop.f32.mrf.mxu1  ;;  %v378_v10 = vmul.f32 %v3950_v54, %v74_v63  ;;  %v508_v21 = vmul.f32 %v3950_v54, %v204_v49 }
 0x11c   :  { %v4036_v44 = vadd.f32 %v1258_v43, %v1043_v39  ;;  %v83_v39 = vld [vmem:[%s4555_s2 + $0x220] sm:$0xff]  ;;  %v94_v43 = vld [vmem:[%s4555_s2 + $0x278] sm:$0xff] }
 0x11e   :  { %1876 = vmatmul.mubr.f32.gmra.mxu0 %v337_v30  ;;  %1954 = vmatmul.mubr.f32.gmra.mxu1 %v467_v31  ;;  %v1047_v50 = vpop.f32.mrf.mxu0  ;;  %v1262_v59 = vpop.f32.mrf.mxu1 }
 0x11f   :  { %2089 = vmatprep.mubr.msk.f32.mxu0 %vm869_vm0, %v348_v34  ;;  %2102 = vmatprep.mubr.msk.f32.mxu1 %vm869_vm0, %v478_v35  ;;  %v4056_v62 = vadd.f32 %v1262_v59, %v1047_v50  ;;  %v507_v34 = vmul.f32 %v3972_v2, %v203_v23  ;;  %v398_v59 = vmul.f32 %v3950_v54, %v94_v43 }
 0x120   :  { %v1049_v57 = vpop.f32.mrf.mxu0  ;;  %v1264_v1 = vpop.f32.mrf.mxu1 }
 0x121   :  { %v4060_v3 = vadd.f32 %v1264_v1, %v1049_v57  ;;  %v223_v57 = vld [vmem:[%s4555_s2 + $0x680] sm:$0xff] }
 0x122   :  { %1882 = vmatmul.mubr.f32.gmra.mxu0 %v347_v47  ;;  %1960 = vmatmul.mubr.f32.gmra.mxu1 %v477_v48  ;;  %v1053_v11 = vpop.f32.mrf.mxu0  ;;  %v224_v47 = vld [vmem:[%s4555_s2 + $0x688] sm:$0xff]  ;;  %v527_v9 = vmul.f32 %v3972_v2, %v223_v57  ;;  %v134_v57 = vld [vmem:[%s4555_s2 + $0x3b8] sm:$0xff] }
 0x123   :  { %2090 = vmatprep.mubr.msk.f32.mxu0 %vm869_vm0, %v358_v51  ;;  %2103 = vmatprep.mubr.msk.f32.mxu1 %vm869_vm0, %v488_v55  ;;  %v1268_v29 = vpop.f32.mrf.mxu1  ;;  %v387_v55 = vmul.f32 %v3972_v2, %v83_v39  ;;  %v528_v60 = vmul.f32 %v3950_v54, %v224_v47  ;;  %v124_v39 = vld [vmem:[%s4555_s2 + $0x368] sm:$0xff] }
 0x124   :  { %v4078_v52 = vadd.f32 %v1268_v29, %v1053_v11  ;;  %v1055_v12 = vpop.f32.mrf.mxu0 }
 0x125   :  { %v1270_v16 = vpop.f32.mrf.mxu1 }
 0x126   :  { %1888 = vmatmul.mubr.f32.gmra.mxu0 %v357_v41  ;;  %1966 = vmatmul.mubr.f32.gmra.mxu1 %v487_v45  ;;  %v4082_v18 = vadd.f32 %v1270_v16, %v1055_v12  ;;  %v1059_v14 = vpop.f32.mrf.mxu0  ;;  %v104_v41 = vld [vmem:[%s4555_s2 + $0x2c8] sm:$0xff]  ;;  %v234_v45 = vld [vmem:[%s4555_s2 + $0x6d8] sm:$0xff]  ;;  %v103_v12 = vld [vmem:[%s4555_s2 + $0x2c0] sm:$0xff] }
 0x127   :  { %2091 = vmatprep.mubr.msk.f32.mxu0 %vm869_vm0, %v368_v4  ;;  %2104 = vmatprep.mubr.msk.f32.mxu1 %vm869_vm0, %v498_v5  ;;  %v1274_v15 = vpop.f32.mrf.mxu1  ;;  %v408_v63 = vmul.f32 %v3950_v54, %v104_v41  ;;  %v538_v49 = vmul.f32 %v3950_v54, %v234_v45  ;;  %v233_v16 = vld [vmem:[%s4555_s2 + $0x6d0] sm:$0xff]  ;;  %v264_v41 = vld [vmem:[%s4555_s2 + $0x7c8] sm:$0xff] }
 0x128   :  { %v4100_v28 = vadd.f32 %v1274_v15, %v1059_v14  ;;  %v1061_v30 = vpop.f32.mrf.mxu0  ;;  %v407_v14 = vmul.f32 %v3972_v2, %v103_v12  ;;  %v537_v15 = vmul.f32 %v3972_v2, %v233_v16  ;;  %v263_v12 = vld [vmem:[%s4555_s2 + $0x7c0] sm:$0xff] }
 0x129   :  { %v1276_v31 = vpop.f32.mrf.mxu1 }
 0x12a   :  { %1894 = vmatmul.mubr.f32.gmra.mxu0 %v367_v17  ;;  %1972 = vmatmul.mubr.f32.gmra.mxu1 %v497_v6  ;;  %v4104_v35 = vadd.f32 %v1276_v31, %v1061_v30  ;;  %v113_v31 = vld [vmem:[%s4555_s2 + $0x310] sm:$0xff] }
 0x12b   :  { %2092 = vmatprep.mubr.msk.f32.mxu0 %vm869_vm0, %v378_v10  ;;  %2105 = vmatprep.mubr.msk.f32.mxu1 %vm869_vm0, %v508_v21  ;;  %v1065_v42 = vpop.f32.mrf.mxu0  ;;  %v1280_v48 = vpop.f32.mrf.mxu1  ;;  %v114_v10 = vld [vmem:[%s4555_s2 + $0x318] sm:$0xff]  ;;  %v244_v21 = vld [vmem:[%s4555_s2 + $0x728] sm:$0xff]  ;;  %v417_v43 = vmul.f32 %v3972_v2, %v113_v31  ;;  %v143_v31 = vld [vmem:[%s4555_s2 + $0x400] sm:$0xff] }
 0x12c   :  { %v4122_v50 = vadd.f32 %v1280_v48, %v1065_v42  ;;  %v418_v25 = vmul.f32 %v3950_v54, %v114_v10  ;;  %v548_v30 = vmul.f32 %v3950_v54, %v244_v21  ;;  %v144_v10 = vld [vmem:[%s4555_s2 + $0x408] sm:$0xff] }
 0x12d   :  { %v1067_v51 = vpop.f32.mrf.mxu0  ;;  %v1282_v58 = vpop.f32.mrf.mxu1 }
 0x12e   :  { %1900 = vmatmul.mubr.f32.gmra.mxu0 %v377_v32  ;;  %1978 = vmatmul.mubr.f32.gmra.mxu1 %v507_v34  ;;  %v4136_v1 = vadd.f32 %v1282_v58, %v1067_v51  ;;  %v243_v32 = vld [vmem:[%s4555_s2 + $0x720] sm:$0xff]  ;;  %v428_v51 = vmul.f32 %v3950_v54, %v124_v39  ;;  %v447_v39 = vmul.f32 %v3972_v2, %v143_v31 }
 0x12f   :  { %2093 = vmatprep.mubr.msk.f32.mxu0 %vm869_vm0, %v388_v36  ;;  %2106 = vmatprep.mubr.msk.f32.mxu1 %vm869_vm0, %v518_v37  ;;  %v547_v47 = vmul.f32 %v3972_v2, %v243_v32  ;;  %v123_v58 = vld [vmem:[%s4555_s2 + $0x360] sm:$0xff] }
 0x130   :  { %v1071_v4 = vpop.f32.mrf.mxu0  ;;  %v1286_v5 = vpop.f32.mrf.mxu1 }
 0x131   :  { %v4146_v11 = vadd.f32 %v1286_v5, %v1071_v4  ;;  %v427_v4 = vmul.f32 %v3972_v2, %v123_v58 }
 0x132   :  { %1906 = vmatmul.mubr.f32.gmra.mxu0 %v387_v55  ;;  %1984 = vmatmul.mubr.f32.gmra.mxu1 %v517_v56  ;;  %v1073_v29 = vpop.f32.mrf.mxu0  ;;  %v1288_v17 = vpop.f32.mrf.mxu1  ;;  %v558_v55 = vmul.f32 %v3950_v54, %v254_v40 }
 0x133   :  { %2094 = vmatprep.mubr.msk.f32.mxu0 %vm869_vm0, %v398_v59  ;;  %2107 = vmatprep.mubr.msk.f32.mxu1 %vm869_vm0, %v528_v60  ;;  %v4158_v6 = vadd.f32 %v1288_v17, %v1073_v29  ;;  %v253_v59 = vld [vmem:[%s4555_s2 + $0x770] sm:$0xff]  ;;  %v568_v29 = vmul.f32 %v3950_v54, %v264_v41 }
 0x134   :  { %v1077_v22 = vpop.f32.mrf.mxu0  ;;  %v557_v5 = vmul.f32 %v3972_v2, %v253_v59 }
 0x135   :  { %v1292_v23 = vpop.f32.mrf.mxu1 }
 0x136   :  { %1912 = vmatmul.mubr.f32.gmra.mxu0 %v397_v8  ;;  %1990 = vmatmul.mubr.f32.gmra.mxu1 %v527_v9  ;;  %v4168_v24 = vadd.f32 %v1292_v23, %v1077_v22  ;;  %v1079_v34 = vpop.f32.mrf.mxu0  ;;  %v438_v9 = vmul.f32 %v3950_v54, %v134_v57  ;;  %v567_v23 = vmul.f32 %v3972_v2, %v263_v12 }
 0x137   :  { %2095 = vmatprep.mubr.msk.f32.mxu0 %vm869_vm0, %v408_v63  ;;  %2108 = vmatprep.mubr.msk.f32.mxu1 %vm869_vm0, %v538_v49  ;;  %v1294_v36 = vpop.f32.mrf.mxu1  ;;  %v133_v49 = vld [vmem:[%s4555_s2 + $0x3b0] sm:$0xff]  ;;  %s2181_s2 = smov [#allocation2]  }
 0x138   :  { %v4180_v37 = vadd.f32 %v1294_v36, %v1079_v34  ;;  %v437_v22 = vmul.f32 %v3972_v2, %v133_v49  ;;  %s2076_s28 = sshll.u32 %s2181_s2, 4  ;;  %s2077_s28 = int_to_ptr.vmem [resolvable:$true] %s2076_s28 }
 0x139   :  { %v1083_v42 = vpop.f32.mrf.mxu0  ;;  %v1298_v48 = vpop.f32.mrf.mxu1  ;;  %s2159_s29 = scalar_lea.vmem %s2077_s28, 6400  ;;  %p2164_p1 = scmp.lt.s32.totalorder %s2077_s28, %s2077_s28 }
 0x13a   :  { %1918 = vmatmul.mubr.f32.gmra.mxu0 %v407_v14  ;;  %1996 = vmatmul.mubr.f32.gmra.mxu1 %v537_v15  ;;  %v4194_v56 = vadd.f32 %v1298_v48, %v1083_v42  ;;  %v448_v15 = vmul.f32 %v3950_v54, %v144_v10  ;;  %p2160_p0 = scmp.ne.s32.totalorder %s2077_s28, %s2159_s29  ;;  %p2165_p2 = scmp.lt.s32.totalorder %s2159_s29, %s2159_s29 }
 0x13b   :  { %2096 = vmatprep.mubr.msk.f32.mxu0 %vm869_vm0, %v418_v25  ;;  %2109 = vmatprep.mubr.msk.f32.mxu1 %vm869_vm0, %v548_v30  ;;  %v1085_v60 = vpop.f32.mrf.mxu0  ;;  %v1300_v61 = vpop.f32.mrf.mxu1 }
 0x13c   :  { %v4208_v45 = vadd.f32 %v1300_v61, %v1085_v60  ;;  %p2166_p3 = por %p2165_p2, %p2164_p1 }
 0x13e   :  { %1924 = vmatmul.mubr.f32.gmra.mxu0 %v417_v43  ;;  %2002 = vmatmul.mubr.f32.gmra.mxu1 %v547_v47  ;;  %v1089_v8 = vpop.f32.mrf.mxu0  ;;  %v1304_v63 = vpop.f32.mrf.mxu1  ;;  %p2167_p4 = pnand %p2166_p3, %p2160_p0 }
 0x13f   :  { %2097 = vmatprep.mubr.msk.f32.mxu0 %vm869_vm0, %v428_v51  ;;  %2110 = vmatprep.mubr.msk.f32.mxu1 %vm869_vm0, %v558_v55  ;;  %v4222_v16 = vadd.f32 %v1304_v63, %v1089_v8 }
 0x140   :  { %v1091_v17 = vpop.f32.mrf.mxu0  ;;  %v1306_v21 = vpop.f32.mrf.mxu1 }
 0x141   :  { %v4229_v14 = vadd.f32 %v1306_v21, %v1091_v17 }
 0x142   :  { %1930 = vmatmul.mubr.f32.gmra.mxu0 %v427_v4  ;;  %2008 = vmatmul.mubr.f32.gmra.mxu1 %v557_v5  ;;  %v1095_v25 = vpop.f32.mrf.mxu0 }
 0x143   :  { %2098 = vmatprep.mubr.msk.f32.mxu0 %vm869_vm0, %v438_v9  ;;  %2111 = vmatprep.mubr.msk.f32.mxu1 %vm869_vm0, %v568_v29  ;;  %v1310_v30 = vpop.f32.mrf.mxu1 }
 0x144   :  { %v4237_v32 = vadd.f32 %v1310_v30, %v1095_v25  ;;  %v1097_v34 = vpop.f32.mrf.mxu0 }
 0x145   :  { %v1312_v36 = vpop.f32.mrf.mxu1 }
 0x146   :  { %1936 = vmatmul.mubr.f32.gmra.mxu0 %v437_v22  ;;  %2014 = vmatmul.mubr.f32.gmra.mxu1 %v567_v23  ;;  %v4240_v40 = vadd.f32 %v1312_v36, %v1097_v34  ;;  %v1101_v42 = vpop.f32.mrf.mxu0 }
 0x147   :  { %2099 = vmatprep.mubr.msk.f32.mxu0 %vm869_vm0, %v448_v15  ;;  %v1316_v54 = vpop.f32.mrf.mxu1 }
 0x148   :  { %v4243_v43 = vadd.f32 %v1316_v54, %v1101_v42  ;;  %v1103_v47 = vpop.f32.mrf.mxu0 }
 0x149   :  { %v1318_v48 = vpop.f32.mrf.mxu1 }
 0x14a   :  { %1942 = vmatmul.mubr.f32.gmra.mxu0 %v447_v39  ;;  %v4245_v51 = vadd.f32 %v1318_v48, %v1103_v47 }
 0x14b   :  { %v1107_v55 = vpop.f32.mrf.mxu0  ;;  %v1322_v58 = vpop.f32.mrf.mxu1 }
 0x14c   :  { %v4247_v59 = vadd.f32 %v1322_v58, %v1107_v55 }
 0x14d   :  { %v1109_v60 = vpop.f32.mrf.mxu0  ;;  %v1324_v61 = vpop.f32.mrf.mxu1 }
 0x14e   :  { %v4249_v2 = vadd.f32 %v1324_v61, %v1109_v60 }
 0x150   :  { %v1113_v57 = vpop.f32.mrf.mxu0  ;;  %v1328_v41 = vpop.f32.mrf.mxu1 }
 0x151   :  { %v4251_v4 = vadd.f32 %v1328_v41, %v1113_v57 }
 0x152   :  { %v1115_v5 = vpop.f32.mrf.mxu0  ;;  %v1330_v8 = vpop.f32.mrf.mxu1 }
 0x153   :  { %v4253_v9 = vadd.f32 %v1330_v8, %v1115_v5 }
 0x154   :  { %v1119_v29 = vpop.f32.mrf.mxu0 }
 0x155   :  { %v1334_v63 = vpop.f32.mrf.mxu1 }
 0x156   :  { %v4255_v49 = vadd.f32 %v1334_v63, %v1119_v29  ;;  %v1121_v12 = vpop.f32.mrf.mxu0 }
 0x157   :  { %v1336_v17 = vpop.f32.mrf.mxu1 }
 0x158   :  { %v4257_v10 = vadd.f32 %v1336_v17, %v1121_v12 }
 0x159   :  { %v1125_v21 = vpop.f32.mrf.mxu0  ;;  %v1340_v22 = vpop.f32.mrf.mxu1 }
 0x15a   :  { %v4259_v23 = vadd.f32 %v1340_v22, %v1125_v21 }
 0x15b   :  { %v1127_v15 = vpop.f32.mrf.mxu0  ;;  %v1342_v25 = vpop.f32.mrf.mxu1 }
 0x15c   :  { %v4261_v30 = vadd.f32 %v1342_v25, %v1127_v15 }
 0x15d   :  { %v1131_v31 = vpop.f32.mrf.mxu0 }
 0x15e   :  { %v1346_v34 = vpop.f32.mrf.mxu1 }
 0x15f   :  { %v4263_v36 = vadd.f32 %v1346_v34, %v1131_v31  ;;  %v1133_v39 = vpop.f32.mrf.mxu0 }
 0x160   :  { %v1348_v42 = vpop.f32.mrf.mxu1 }
 0x161   :  { %4557 = vst [vmem:[#allocation5_spill] sm:$0xff] %v4263_v36  ;;  %v4265_v54 = vadd.f32 %v1348_v42, %v1133_v39 }
 0x162   :  { %v1137_v47 = vpop.f32.mrf.mxu0  ;;  %v1352_v48 = vpop.f32.mrf.mxu1 }
 0x163   :  { %4558 = vst [vmem:[#allocation6_spill] sm:$0xff] %v4265_v54  ;;  %v4267_v55 = vadd.f32 %v1352_v48, %v1137_v47 }
 0x164   :  { %v1139_v58 = vpop.f32.mrf.mxu0  ;;  %v1354_v60 = vpop.f32.mrf.mxu1 }
 0x165   :  { %4559 = vst [vmem:[#allocation7_spill] sm:$0xff] %v4267_v55  ;;  %v4269_v61 = vadd.f32 %v1354_v60, %v1139_v58 }
 0x166   :  { %v1143_v57 = vpop.f32.mrf.mxu0 }
 0x167   :  { %4560 = vst [vmem:[#allocation8_spill] sm:$0xff] %v4269_v61  ;;  %v1358_v41 = vpop.f32.mrf.mxu1 }
 0x168   :  { %v4271_v5 = vadd.f32 %v1358_v41, %v1143_v57  ;;  %v1145_v8 = vpop.f32.mrf.mxu0 }
 0x169   :  { %v1360_v29 = vpop.f32.mrf.mxu1 }
 0x16a   :  { %4561 = vst [vmem:[#allocation9_spill] sm:$0xff] %v4271_v5  ;;  %v4273_v63 = vadd.f32 %v1360_v29, %v1145_v8 }
 0x16b   :  { %v1149_v12 = vpop.f32.mrf.mxu0  ;;  %v1364_v17 = vpop.f32.mrf.mxu1 }
 0x16c   :  { %4562 = vst [vmem:[#allocation10_spill] sm:$0xff] %v4273_v63  ;;  %v4275_v21 = vadd.f32 %v1364_v17, %v1149_v12 }
 0x16d   :  { %v1151_v22 = vpop.f32.mrf.mxu0  ;;  %v1366_v15 = vpop.f32.mrf.mxu1 }
 0x16e   :  { %4563 = vst [vmem:[#allocation11_spill] sm:$0xff] %v4275_v21  ;;  %v4277_v25 = vadd.f32 %v1366_v15, %v1151_v22 }
 0x170   :  { %4564 = vst [vmem:[#allocation12_spill] sm:$0xff] %v4277_v25  ;;  %v1155_v31 = vpop.f32.mrf.mxu0 }
 0x171   :  { %v1370_v34 = vpop.f32.mrf.mxu1 }
 0x172   :  { %v4279_v39 = vadd.f32 %v1370_v34, %v1155_v31  ;;  %v1157_v42 = vpop.f32.mrf.mxu0 }
 0x173   :  { %v1372_v47 = vpop.f32.mrf.mxu1 }
 0x174   :  { %4565 = vst [vmem:[#allocation13_spill] sm:$0xff] %v4279_v39  ;;  %v4281_v48 = vadd.f32 %v1372_v47, %v1157_v42 }
 0x176   :  { %4566 = vst [vmem:[#allocation14_spill] sm:$0xff] %v4281_v48  ;;  %v1441_v58 = vpop.f32.mrf.mxu0  ;;  %v1656_v60 = vpop.f32.mrf.mxu1 }
 0x177   :  { %v1442_v57 = vadd.f32 %v1441_v58, %v3894_v19 }
 0x178   :  { %v1443_v41 = vpop.f32.mrf.mxu0  ;;  %v1658_v8 = vpop.f32.mrf.mxu1 }
 0x179   :  { %v4284_v29 = vadd.f32 %v1656_v60, %v1442_v57  ;;  %v1444_v12 = vadd.f32 %v1443_v41, %v3912_v27 }
 0x17a   :  { %v1447_v17 = vpop.f32.mrf.mxu0  ;;  %v1662_v22 = vpop.f32.mrf.mxu1 }
 0x17b   :  { %v4287_v15 = vadd.f32 %v1658_v8, %v1444_v12  ;;  %v1448_v31 = vadd.f32 %v1447_v17, %v3920_v33 }
 0x17c   :  { %v1449_v34 = vpop.f32.mrf.mxu0  ;;  %v1664_v39 = vpop.f32.mrf.mxu1 }
 0x17d   :  { %v4290_v42 = vadd.f32 %v1662_v22, %v1448_v31  ;;  %v1450_v47 = vadd.f32 %v1449_v34, %v3938_v46 }
 0x17e   :  { %v1453_v48 = vpop.f32.mrf.mxu0  ;;  %v1668_v19 = vpop.f32.mrf.mxu1 }
 0x17f   :  { %v4293_v58 = vadd.f32 %v1664_v39, %v1450_v47  ;;  %v1454_v60 = vadd.f32 %v1453_v48, %v3946_v53 }
 0x180   :  { %v1455_v57 = vpop.f32.mrf.mxu0  ;;  %v1670_v27 = vpop.f32.mrf.mxu1 }
 0x181   :  { %v4296_v41 = vadd.f32 %v1668_v19, %v1454_v60  ;;  %v1456_v8 = vadd.f32 %v1455_v57, %v3962_v0 }
 0x182   :  { %v1459_v12 = vpop.f32.mrf.mxu0  ;;  %v1674_v33 = vpop.f32.mrf.mxu1 }
 0x183   :  { %v4299_v17 = vadd.f32 %v1670_v27, %v1456_v8  ;;  %v1460_v22 = vadd.f32 %v1459_v12, %v3976_v7 }
 0x184   :  { %v1461_v31 = vpop.f32.mrf.mxu0  ;;  %v1676_v46 = vpop.f32.mrf.mxu1 }
 0x185   :  { %v4302_v34 = vadd.f32 %v1674_v33, %v1460_v22  ;;  %v1462_v39 = vadd.f32 %v1461_v31, %v3992_v13 }
 0x186   :  { %v1465_v47 = vpop.f32.mrf.mxu0  ;;  %v1680_v53 = vpop.f32.mrf.mxu1 }
 0x187   :  { %v4305_v48 = vadd.f32 %v1676_v46, %v1462_v39  ;;  %v1466_v19 = vadd.f32 %v1465_v47, %v3996_v20 }
 0x188   :  { %v1467_v60 = vpop.f32.mrf.mxu0  ;;  %v1682_v0 = vpop.f32.mrf.mxu1 }
 0x189   :  { %v4308_v57 = vadd.f32 %v1680_v53, %v1466_v19  ;;  %v1468_v27 = vadd.f32 %v1467_v60, %v4014_v26 }
 0x18a   :  { %v1471_v8 = vpop.f32.mrf.mxu0  ;;  %v1686_v7 = vpop.f32.mrf.mxu1 }
 0x18b   :  { %v4311_v12 = vadd.f32 %v1682_v0, %v1468_v27  ;;  %v1472_v33 = vadd.f32 %v1471_v8, %v4028_v38 }
 0x18c   :  { %v1473_v22 = vpop.f32.mrf.mxu0  ;;  %v1688_v13 = vpop.f32.mrf.mxu1 }
 0x18d   :  { %v4314_v31 = vadd.f32 %v1686_v7, %v1472_v33  ;;  %v1474_v46 = vadd.f32 %v1473_v22, %v4036_v44 }
 0x18e   :  { %v1477_v39 = vpop.f32.mrf.mxu0  ;;  %v1692_v20 = vpop.f32.mrf.mxu1 }
 0x18f   :  { %v4317_v47 = vadd.f32 %v1688_v13, %v1474_v46  ;;  %v1478_v53 = vadd.f32 %v1477_v39, %v4056_v62 }
 0x190   :  { %v1479_v19 = vpop.f32.mrf.mxu0  ;;  %v1694_v26 = vpop.f32.mrf.mxu1 }
 0x191   :  { %4567 = vst [vmem:[#allocation15_spill] sm:$0xff] %v4317_v47  ;;  %v4320_v60 = vadd.f32 %v1692_v20, %v1478_v53  ;;  %v1480_v0 = vadd.f32 %v1479_v19, %v4060_v3 }
 0x192   :  { %v1483_v27 = vpop.f32.mrf.mxu0  ;;  %v1698_v38 = vpop.f32.mrf.mxu1 }
 0x193   :  { %4568 = vst [vmem:[#allocation16_spill] sm:$0xff] %v4320_v60  ;;  %v4323_v8 = vadd.f32 %v1694_v26, %v1480_v0  ;;  %v1484_v7 = vadd.f32 %v1483_v27, %v4078_v52 }
 0x194   :  { %v1485_v33 = vpop.f32.mrf.mxu0  ;;  %v1700_v44 = vpop.f32.mrf.mxu1 }
 0x195   :  { %4569 = vst [vmem:[#allocation17_spill] sm:$0xff] %v4323_v8  ;;  %v4326_v22 = vadd.f32 %v1698_v38, %v1484_v7  ;;  %v1486_v13 = vadd.f32 %v1485_v33, %v4082_v18 }
 0x196   :  { %v1489_v46 = vpop.f32.mrf.mxu0  ;;  %v1704_v62 = vpop.f32.mrf.mxu1 }
 0x197   :  { %4570 = vst [vmem:[#allocation18_spill] sm:$0xff] %v4326_v22  ;;  %v4329_v39 = vadd.f32 %v1700_v44, %v1486_v13  ;;  %v1490_v20 = vadd.f32 %v1489_v46, %v4100_v28 }
 0x198   :  { %v1491_v53 = vpop.f32.mrf.mxu0  ;;  %v1706_v3 = vpop.f32.mrf.mxu1 }
 0x199   :  { %4571 = vst [vmem:[#allocation19_spill] sm:$0xff] %v4329_v39  ;;  %v4332_v19 = vadd.f32 %v1704_v62, %v1490_v20  ;;  %v1492_v26 = vadd.f32 %v1491_v53, %v4104_v35 }
 0x19a   :  { %v1495_v0 = vpop.f32.mrf.mxu0  ;;  %v1710_v52 = vpop.f32.mrf.mxu1 }
 0x19b   :  { %4572 = vst [vmem:[#allocation20_spill] sm:$0xff] %v4332_v19  ;;  %v4335_v27 = vadd.f32 %v1706_v3, %v1492_v26  ;;  %v1496_v38 = vadd.f32 %v1495_v0, %v4122_v50 }
 0x19c   :  { %v1497_v7 = vpop.f32.mrf.mxu0  ;;  %v1712_v18 = vpop.f32.mrf.mxu1 }
 0x19d   :  { %4573 = vst [vmem:[#allocation21_spill] sm:$0xff] %v4335_v27  ;;  %v4338_v33 = vadd.f32 %v1710_v52, %v1496_v38  ;;  %v1498_v44 = vadd.f32 %v1497_v7, %v4136_v1 }
 0x19e   :  { %v1501_v13 = vpop.f32.mrf.mxu0  ;;  %v1716_v28 = vpop.f32.mrf.mxu1 }
 0x19f   :  { %4574 = vst [vmem:[#allocation22_spill] sm:$0xff] %v4338_v33  ;;  %v4341_v46 = vadd.f32 %v1712_v18, %v1498_v44  ;;  %v1502_v62 = vadd.f32 %v1501_v13, %v4146_v11 }
 0x1a0   :  { %v1503_v20 = vpop.f32.mrf.mxu0  ;;  %v1718_v35 = vpop.f32.mrf.mxu1 }
 0x1a1   :  { %4575 = vst [vmem:[#allocation23_spill] sm:$0xff] %v4341_v46  ;;  %v4344_v53 = vadd.f32 %v1716_v28, %v1502_v62  ;;  %v1504_v3 = vadd.f32 %v1503_v20, %v4158_v6 }
 0x1a2   :  { %v1507_v26 = vpop.f32.mrf.mxu0  ;;  %v1722_v50 = vpop.f32.mrf.mxu1 }
 0x1a3   :  { %4576 = vst [vmem:[#allocation24_spill] sm:$0xff] %v4344_v53  ;;  %v4347_v0 = vadd.f32 %v1718_v35, %v1504_v3  ;;  %v1508_v52 = vadd.f32 %v1507_v26, %v4168_v24 }
 0x1a4   :  { %v1509_v38 = vpop.f32.mrf.mxu0  ;;  %v1724_v1 = vpop.f32.mrf.mxu1 }
 0x1a5   :  { %4577 = vst [vmem:[#allocation25_spill] sm:$0xff] %v4347_v0  ;;  %v4350_v7 = vadd.f32 %v1722_v50, %v1508_v52  ;;  %v1510_v18 = vadd.f32 %v1509_v38, %v4180_v37 }
 0x1a6   :  { %v1513_v44 = vpop.f32.mrf.mxu0  ;;  %v1728_v11 = vpop.f32.mrf.mxu1 }
 0x1a7   :  { %4578 = vst [vmem:[#allocation26_spill] sm:$0xff] %v4350_v7  ;;  %v4353_v13 = vadd.f32 %v1724_v1, %v1510_v18  ;;  %v1514_v28 = vadd.f32 %v1513_v44, %v4194_v56 }
 0x1a8   :  { %v1515_v62 = vpop.f32.mrf.mxu0  ;;  %v1730_v6 = vpop.f32.mrf.mxu1 }
 0x1a9   :  { %4579 = vst [vmem:[#allocation27_spill] sm:$0xff] %v4353_v13  ;;  %v4356_v20 = vadd.f32 %v1728_v11, %v1514_v28  ;;  %v1516_v35 = vadd.f32 %v1515_v62, %v4208_v45 }
 0x1aa   :  { %v1519_v3 = vpop.f32.mrf.mxu0  ;;  %v1734_v24 = vpop.f32.mrf.mxu1 }
 0x1ab   :  { %4580 = vst [vmem:[#allocation28_spill] sm:$0xff] %v4356_v20  ;;  %v4359_v26 = vadd.f32 %v1730_v6, %v1516_v35 }
 0x1ac   :  { %v1521_v50 = vpop.f32.mrf.mxu0  ;;  %v1736_v52 = vpop.f32.mrf.mxu1 }
 0x1ad   :  { %4581 = vst [vmem:[#allocation29_spill] sm:$0xff] %v4359_v26 }
 0x1ae   :  { %v1525_v7 = vpop.f32.mrf.mxu0  ;;  %v1740_v37 = vpop.f32.mrf.mxu1 }
 0x1b0   :  { %v1527_v38 = vpop.f32.mrf.mxu0  ;;  %v1742_v0 = vpop.f32.mrf.mxu1 }
 0x1b2   :  { %v1531_v1 = vpop.f32.mrf.mxu0  ;;  %v4361_v18 = vpop.f32.mrf.mxu1 }
 0x1b4   :  { %v1533_v56 = vpop.f32.mrf.mxu0  ;;  %v4363_v44 = vpop.f32.mrf.mxu1 }
 0x1b6   :  { %v4365_v11 = vpop.f32.mrf.mxu0  ;;  %v4367_v28 = vpop.f32.mrf.mxu1 }
 0x1b8   :  { %v4369_v45 = vpop.f32.mrf.mxu0  ;;  %v4371_v62 = vpop.f32.mrf.mxu1 }
 0x1ba   :  { %v4373_v6 = vpop.f32.mrf.mxu0  ;;  %v4375_v35 = vpop.f32.mrf.mxu1 }
 0x1bc   :  { %v4377_v26 = vpop.f32.mrf.mxu0  ;;  %v4379_v20 = vpop.f32.mrf.mxu1 }
 0x1be   :  { %v4381_v13 = vpop.f32.mrf.mxu0  ;;  %v4383_v53 = vpop.f32.mrf.mxu1 }
 0x1c0   :  { %v4385_v46 = vpop.f32.mrf.mxu0  ;;  %v4387_v33 = vpop.f32.mrf.mxu1 }
 0x1c2   :  { %v4389_v25 = vpop.f32.mrf.mxu0  ;;  %v4391_v27 = vpop.f32.mrf.mxu1 }
 0x1c3   :  { %4582 = vst [vmem:[#allocation30_spill] sm:$0xff] %v4391_v27 }
 0x1c4   :  { %v4393_v21 = vpop.f32.mrf.mxu0  ;;  %v4395_v19 = vpop.f32.mrf.mxu1 }
 0x1c5   :  { %4583 = vst [vmem:[#allocation31_spill] sm:$0xff] %v4395_v19 }
 0x1c6   :  { %v4397_v63 = vpop.f32.mrf.mxu0  ;;  %v4399_v39 = vpop.f32.mrf.mxu1 }
 0x1c7   :  { %4584 = vst [vmem:[#allocation32_spill] sm:$0xff] %v4397_v63  ;;  %4585 = vst [vmem:[#allocation33_spill] sm:$0xff] %v4399_v39 }
 0x1c8   :  { %v4401_v5 = vpop.f32.mrf.mxu0  ;;  %v4403_v22 = vpop.f32.mrf.mxu1 }
 0x1c9   :  { %4586 = vst [vmem:[#allocation34_spill] sm:$0xff] %v4401_v5  ;;  %4587 = vst [vmem:[#allocation35_spill] sm:$0xff] %v4403_v22 }
 0x1ca   :  { %v4405_v61 = vpop.f32.mrf.mxu0  ;;  %v4407_v8 = vpop.f32.mrf.mxu1 }
 0x1cb   :  { %4588 = vst [vmem:[#allocation36_spill] sm:$0xff] %v4405_v61  ;;  %4589 = vst [vmem:[#allocation37_spill] sm:$0xff] %v4407_v8  ;;  %v1520_v8 = vadd.f32 %v1519_v3, %v4222_v16 }
 0x1cc   :  { %v4409_v55 = vpop.f32.mrf.mxu0  ;;  %v4411_v60 = vpop.f32.mrf.mxu1 }
 0x1cd   :  { %4590 = vst [vmem:[#allocation38_spill] sm:$0xff] %v4409_v55  ;;  %4591 = vst [vmem:[#allocation39_spill] sm:$0xff] %v4411_v60 }
 0x1ce   :  { %v4413_v54 = vpop.f32.mrf.mxu0  ;;  %v4415_v47 = vpop.f32.mrf.mxu1 }
 0x1cf   :  { %4592 = vst [vmem:[#allocation40_spill] sm:$0xff] %v4413_v54  ;;  %4593 = vst [vmem:[#allocation41_spill] sm:$0xff] %v4415_v47  ;;  %v1522_v47 = vadd.f32 %v1521_v50, %v4229_v14  ;;  %v1532_v14 = vadd.f32 %v1531_v1, %v4243_v43 }
 0x1d0   :  { %v4417_v19 = vpop.f32.mrf.mxu0  ;;  %v4419_v63 = vpop.f32.mrf.mxu1 }
 0x1d1   :  { %4594 = vst [vmem:[#allocation42_spill] sm:$0xff] %v4417_v19  ;;  %4595 = vst [vmem:[#allocation43_spill] sm:$0xff] %v4419_v63  ;;  %v1735_v63 = vadd.f32 %v1734_v24, %v1520_v8  ;;  %v1747_v43 = vadd.f32 %v4361_v18, %v1532_v14 }
 0x1d2   :  { %v4421_v39 = vpop.f32.mrf.mxu0  ;;  %v4423_v5 = vpop.f32.mrf.mxu1 }
 0x1d3   :  { %4596 = vst [vmem:[#allocation44_spill] sm:$0xff] %v4421_v39  ;;  %4597 = vst [vmem:[#allocation45_spill] sm:$0xff] %v4423_v5  ;;  %v1526_v39 = vadd.f32 %v1525_v7, %v4237_v32 }
 0x1d4   :  { %v4425_v22 = vpop.f32.mrf.mxu0  ;;  %v4427_v61 = vpop.f32.mrf.mxu1 }
 0x1d5   :  { %4598 = vst [vmem:[#allocation46_spill] sm:$0xff] %v4425_v22  ;;  %4599 = vst [vmem:[#allocation47_spill] sm:$0xff] %v4427_v61  ;;  %v1737_v22 = vadd.f32 %v1736_v52, %v1522_v47  ;;  %v1528_v61 = vadd.f32 %v1527_v38, %v4240_v40  ;;  %v1741_v27 = vadd.f32 %v1740_v37, %v1526_v39 }
 0x1d6   :  { %v4430_v55 = vpop.f32.mrf.mxu0  ;;  %v4432_v60 = vpop.f32.mrf.mxu1  ;;  %v1534_v47 = vadd.f32 %v1533_v56, %v4245_v51 }
 0x1d7   :  { %4600 = vst [vmem:[#allocation48_spill] sm:$0xff] %v4430_v55  ;;  %4601 = vst [vmem:[#allocation49_spill] sm:$0xff] %v4432_v60  ;;  %v1743_v50 = vadd.f32 %v1742_v0, %v1528_v61 }
 0x1d8   :  { %v4435_v54 = vpop.f32.mrf.mxu0  ;;  %v4437_v19 = vpop.f32.mrf.mxu1 }
 0x1da   :  { %v1871_v5 = vpop.f32.mrf.mxu0  ;;  %v1949_v36 = vpop.f32.mrf.mxu1 }
 0x1db   :  { %v1872_v16 = vadd.f32 %v1871_v5, %v4284_v29  ;;  %v1950_v3 = vadd.f32 %v1949_v36, %v1735_v63 }
 0x1dc   :  { %v1873_v55 = vpop.f32.mrf.mxu0  ;;  %v1951_v60 = vpop.f32.mrf.mxu1 }
 0x1dd   :  { %2020 = vst [vmem:[#allocation2] sm:$0xff] %v1872_v16  ;;  %2047 = vst [vmem:[#allocation2 + $0xd0] sm:$0xff] %v1950_v3  ;;  %v1874_v8 = vadd.f32 %v1873_v55, %v4287_v15  ;;  %v1952_v24 = vadd.f32 %v1951_v60, %v1737_v22  ;;  %v1538_v55 = vadd.f32 %v4365_v11, %v4247_v59 }
 0x1de   :  { %v1877_v32 = vpop.f32.mrf.mxu0  ;;  %v1955_v7 = vpop.f32.mrf.mxu1  ;;  %v1749_v60 = vadd.f32 %v4363_v44, %v1534_v47 }
 0x1df   :  { %2022 = vst.msk [vmem:[#allocation2 + $0x8] sm:$0xff] %vm2021_vm1, %v1874_v8  ;;  %2048 = vst.msk [vmem:[#allocation2 + $0xd8] sm:$0xff] %vm2021_vm1, %v1952_v24  ;;  %v1878_v40 = vadd.f32 %v1877_v32, %v4290_v42  ;;  %v1956_v36 = vadd.f32 %v1955_v7, %v1741_v27  ;;  %v1540_v42 = vadd.f32 %v4369_v45, %v4249_v2  ;;  %v4602_v24 = vld [vmem:[#allocation30_spill] sm:$0xff]  ;;  %v4604_v7 = vld [vmem:[#allocation32_spill] sm:$0xff] }
 0x1e0   :  { %v1879_v5 = vpop.f32.mrf.mxu0  ;;  %v1957_v63 = vpop.f32.mrf.mxu1  ;;  %v1753_v0 = vadd.f32 %v4367_v28, %v1538_v55  ;;  %v4609_v55 = vld [vmem:[#allocation16_spill] sm:$0xff] }
 0x1e1   :  { %2023 = vst [vmem:[#allocation2 + $0x10] sm:$0xff] %v1878_v40  ;;  %2049 = vst [vmem:[#allocation2 + $0xe0] sm:$0xff] %v1956_v36  ;;  %v1880_v61 = vadd.f32 %v1879_v5, %v4293_v58  ;;  %v1958_v29 = vadd.f32 %v1957_v63, %v1743_v50  ;;  %v1544_v58 = vadd.f32 %v4373_v6, %v4251_v4  ;;  %v4606_v36 = vld [vmem:[#allocation31_spill] sm:$0xff]  ;;  %v4607_v63 = vld [vmem:[#allocation6_spill] sm:$0xff] }
 0x1e2   :  { %v1883_v51 = vpop.f32.mrf.mxu0  ;;  %v1961_v15 = vpop.f32.mrf.mxu1  ;;  %v1755_v1 = vadd.f32 %v4371_v62, %v1540_v42 }
 0x1e3   :  { %2024 = vst.msk [vmem:[#allocation2 + $0x18] sm:$0xff] %vm2021_vm1, %v1880_v61  ;;  %2050 = vst.msk [vmem:[#allocation2 + $0xe8] sm:$0xff] %vm2021_vm1, %v1958_v29  ;;  %v1884_v22 = vadd.f32 %v1883_v51, %v4296_v41  ;;  %v1962_v39 = vadd.f32 %v1961_v15, %v1747_v43  ;;  %v1546_v41 = vadd.f32 %v4377_v26, %v4253_v9  ;;  %v4608_v43 = vld [vmem:[#allocation34_spill] sm:$0xff] }
 0x1e4   :  { %v1885_v59 = vpop.f32.mrf.mxu0  ;;  %v1963_v27 = vpop.f32.mrf.mxu1  ;;  %v1759_v11 = vadd.f32 %v4375_v35, %v1544_v58 }
 0x1e5   :  { %2025 = vst [vmem:[#allocation2 + $0x20] sm:$0xff] %v1884_v22  ;;  %2051 = vst [vmem:[#allocation2 + $0xf0] sm:$0xff] %v1962_v39  ;;  %v1886_v52 = vadd.f32 %v1885_v59, %v4299_v17  ;;  %v1964_v37 = vadd.f32 %v1963_v27, %v1749_v60  ;;  %v1550_v17 = vadd.f32 %v4381_v13, %v4255_v49  ;;  %v4610_v60 = vld [vmem:[#allocation33_spill] sm:$0xff]  ;;  %v4611_v22 = vld [vmem:[#allocation7_spill] sm:$0xff] }
 0x1e6   :  { %v1889_v2 = vpop.f32.mrf.mxu0  ;;  %v1967_v38 = vpop.f32.mrf.mxu1  ;;  %v1761_v62 = vadd.f32 %v4379_v20, %v1546_v41  ;;  %v4612_v39 = vld [vmem:[#allocation36_spill] sm:$0xff]  ;;  %v4613_v27 = vld [vmem:[#allocation17_spill] sm:$0xff]  ;;  %v4616_v41 = vld [vmem:[#allocation38_spill] sm:$0xff] }
 0x1e7   :  { %2026 = vst.msk [vmem:[#allocation2 + $0x28] sm:$0xff] %vm2021_vm1, %v1886_v52  ;;  %2052 = vst.msk [vmem:[#allocation2 + $0xf8] sm:$0xff] %vm2021_vm1, %v1964_v37  ;;  %v1890_v18 = vadd.f32 %v1889_v2, %v4302_v34  ;;  %v1968_v56 = vadd.f32 %v1967_v38, %v1753_v0  ;;  %v1552_v34 = vadd.f32 %v4385_v46, %v4257_v10  ;;  %v4614_v2 = vld [vmem:[#allocation35_spill] sm:$0xff] }
 0x1e8   :  { %v1891_v4 = vpop.f32.mrf.mxu0  ;;  %v1969_v44 = vpop.f32.mrf.mxu1  ;;  %v1765_v16 = vadd.f32 %v4383_v53, %v1550_v17  ;;  %v1568_v59 = vadd.f32 %v4612_v39, %v4611_v22  ;;  %v4637_v39 = vld [vmem:[#allocation23_spill] sm:$0xff] }
 0x1e9   :  { %2027 = vst [vmem:[#allocation2 + $0x30] sm:$0xff] %v1890_v18  ;;  %2053 = vst [vmem:[#allocation2 + $0x100] sm:$0xff] %v1968_v56  ;;  %v1892_v28 = vadd.f32 %v1891_v4, %v4305_v48  ;;  %v1970_v45 = vadd.f32 %v1969_v44, %v1755_v1  ;;  %v1556_v48 = vadd.f32 %v4389_v25, %v4259_v23  ;;  %v4615_v1 = vld [vmem:[#allocation8_spill] sm:$0xff]  ;;  %v4617_v56 = vld [vmem:[#allocation18_spill] sm:$0xff] }
 0x1ea   :  { %v1895_v9 = vpop.f32.mrf.mxu0  ;;  %v1973_v26 = vpop.f32.mrf.mxu1  ;;  %v1767_v14 = vadd.f32 %v4387_v33, %v1552_v34  ;;  %v4605_v33 = vld [vmem:[#allocation15_spill] sm:$0xff]  ;;  %v1570_v18 = vadd.f32 %v4616_v41, %v4615_v1  ;;  %v4640_v1 = vld [vmem:[#allocation24_spill] sm:$0xff] }
 0x1eb   :  { %2028 = vst.msk [vmem:[#allocation2 + $0x38] sm:$0xff] %vm2021_vm1, %v1892_v28  ;;  %2054 = vst.msk [vmem:[#allocation2 + $0x108] sm:$0xff] %vm2021_vm1, %v1970_v45  ;;  %v1896_v6 = vadd.f32 %v1895_v9, %v4308_v57  ;;  %v1974_v35 = vadd.f32 %v1973_v26, %v1759_v11  ;;  %v1558_v57 = vadd.f32 %v4393_v21, %v4261_v30  ;;  %v4618_v28 = vld [vmem:[#allocation37_spill] sm:$0xff]  ;;  %v4620_v26 = vld [vmem:[#allocation40_spill] sm:$0xff] }
 0x1ec   :  { %v1897_v49 = vpop.f32.mrf.mxu0  ;;  %v1975_v13 = vpop.f32.mrf.mxu1  ;;  %v1771_v32 = vadd.f32 %v4602_v24, %v1556_v48  ;;  %v1783_v45 = vadd.f32 %v4618_v28, %v1568_v59  ;;  %v4619_v9 = vld [vmem:[#allocation9_spill] sm:$0xff]  ;;  %v4621_v34 = vld [vmem:[#allocation19_spill] sm:$0xff] }
 0x1ed   :  { %2029 = vst [vmem:[#allocation2 + $0x40] sm:$0xff] %v1896_v6  ;;  %2055 = vst [vmem:[#allocation2 + $0x110] sm:$0xff] %v1974_v35  ;;  %v1898_v20 = vadd.f32 %v1897_v49, %v4311_v12  ;;  %v1976_v3 = vadd.f32 %v1975_v13, %v1761_v62  ;;  %v4603_v12 = vld [vmem:[#allocation5_spill] sm:$0xff]  ;;  %v1773_v5 = vadd.f32 %v4606_v36, %v1558_v57  ;;  %v4627_v24 = vld [vmem:[#allocation11_spill] sm:$0xff] }
 0x1ee   :  { %v1901_v10 = vpop.f32.mrf.mxu0  ;;  %v1979_v46 = vpop.f32.mrf.mxu1  ;;  %v1562_v50 = vadd.f32 %v4604_v7, %v4603_v12  ;;  %v1574_v62 = vadd.f32 %v4620_v26, %v4619_v9  ;;  %v4629_v7 = vld [vmem:[#allocation21_spill] sm:$0xff]  ;;  %v4631_v36 = vld [vmem:[#allocation12_spill] sm:$0xff] }
 0x1ef   :  { %2030 = vst.msk [vmem:[#allocation2 + $0x48] sm:$0xff] %vm2021_vm1, %v1898_v20  ;;  %2056 = vst.msk [vmem:[#allocation2 + $0x118] sm:$0xff] %vm2021_vm1, %v1976_v3  ;;  %v1902_v53 = vadd.f32 %v1901_v10, %v4314_v31  ;;  %v1980_v8 = vadd.f32 %v1979_v46, %v1765_v16  ;;  %v1564_v31 = vadd.f32 %v4608_v43, %v4607_v63  ;;  %v4622_v16 = vld [vmem:[#allocation39_spill] sm:$0xff]  ;;  %v4623_v20 = vld [vmem:[#allocation10_spill] sm:$0xff] }
 0x1f0   :  { %v1903_v23 = vpop.f32.mrf.mxu0  ;;  %v1981_v25 = vpop.f32.mrf.mxu1  ;;  %v1777_v42 = vadd.f32 %v4610_v60, %v1562_v50  ;;  %v1785_v48 = vadd.f32 %v4622_v16, %v1570_v18  ;;  %v4624_v3 = vld [vmem:[#allocation42_spill] sm:$0xff]  ;;  %v4625_v46 = vld [vmem:[#allocation20_spill] sm:$0xff]  ;;  %v4635_v60 = vld [vmem:[#allocation13_spill] sm:$0xff] }
 0x1f1   :  { %2031 = vst [vmem:[#allocation2 + $0x50] sm:$0xff] %v1902_v53  ;;  %2057 = vst [vmem:[#allocation2 + $0x120] sm:$0xff] %v1980_v8  ;;  %v1904_v47 = vadd.f32 %v1903_v23, %v4605_v33  ;;  %v1982_v40 = vadd.f32 %v1981_v25, %v1767_v14  ;;  %v1779_v38 = vadd.f32 %v4614_v2, %v1564_v31  ;;  %v4626_v23 = vld [vmem:[#allocation41_spill] sm:$0xff]  ;;  %v4633_v43 = vld [vmem:[#allocation22_spill] sm:$0xff] }
 0x1f2   :  { %v1907_v30 = vpop.f32.mrf.mxu0  ;;  %v1985_v21 = vpop.f32.mrf.mxu1  ;;  %v1576_v10 = vadd.f32 %v4624_v3, %v4623_v20  ;;  %v1789_v25 = vadd.f32 %v4626_v23, %v1574_v62  ;;  %v4639_v2 = vld [vmem:[#allocation14_spill] sm:$0xff] }
 0x1f3   :  { %2032 = vst.msk [vmem:[#allocation2 + $0x58] sm:$0xff] %vm2021_vm1, %v1904_v47  ;;  %2058 = vst.msk [vmem:[#allocation2 + $0x128] sm:$0xff] %vm2021_vm1, %v1982_v40  ;;  %v1908_v61 = vadd.f32 %v1907_v30, %v4609_v55  ;;  %v1986_v29 = vadd.f32 %v1985_v21, %v1771_v32  ;;  %v4628_v32 = vld [vmem:[#allocation44_spill] sm:$0xff]  ;;  %v4630_v30 = vld [vmem:[#allocation43_spill] sm:$0xff] }
 0x1f4   :  { %v1909_v51 = vpop.f32.mrf.mxu0  ;;  %v1987_v15 = vpop.f32.mrf.mxu1  ;;  %v1580_v12 = vadd.f32 %v4628_v32, %v4627_v24  ;;  %v1791_v21 = vadd.f32 %v4630_v30, %v1576_v10  ;;  %v4643_v62 = vld [vmem:[#allocation26_spill] sm:$0xff] }
 0x1f5   :  { %2033 = vst [vmem:[#allocation2 + $0x60] sm:$0xff] %v1908_v61  ;;  %2059 = vst [vmem:[#allocation2 + $0x130] sm:$0xff] %v1986_v29  ;;  %v1910_v0 = vadd.f32 %v1909_v51, %v4613_v27  ;;  %v1988_v58 = vadd.f32 %v1987_v15, %v1773_v5  ;;  %v4632_v5 = vld [vmem:[#allocation46_spill] sm:$0xff]  ;;  %v4634_v51 = vld [vmem:[#allocation45_spill] sm:$0xff] }
 0x1f6   :  { %v1913_v52 = vpop.f32.mrf.mxu0  ;;  %v1991_v37 = vpop.f32.mrf.mxu1  ;;  %v1582_v63 = vadd.f32 %v4632_v5, %v4631_v36  ;;  %v1795_v15 = vadd.f32 %v4634_v51, %v1580_v12 }
 0x1f7   :  { %2034 = vst.msk [vmem:[#allocation2 + $0x68] sm:$0xff] %vm2021_vm1, %v1910_v0  ;;  %2060 = vst.msk [vmem:[#allocation2 + $0x138] sm:$0xff] %vm2021_vm1, %v1988_v58  ;;  %v1914_v4 = vadd.f32 %v1913_v52, %v4617_v56  ;;  %v1992_v44 = vadd.f32 %v1991_v37, %v1777_v42  ;;  %v4636_v42 = vld [vmem:[#allocation48_spill] sm:$0xff]  ;;  %v4638_v52 = vld [vmem:[#allocation47_spill] sm:$0xff] }
 0x1f8   :  { %v1915_v11 = vpop.f32.mrf.mxu0  ;;  %v1993_v17 = vpop.f32.mrf.mxu1  ;;  %v1586_v22 = vadd.f32 %v4636_v42, %v4635_v60  ;;  %v1797_v37 = vadd.f32 %v4638_v52, %v1582_v63 }
 0x1f9   :  { %2035 = vst [vmem:[#allocation2 + $0x70] sm:$0xff] %v1914_v4  ;;  %2061 = vst [vmem:[#allocation2 + $0x140] sm:$0xff] %v1992_v44  ;;  %v1916_v6 = vadd.f32 %v1915_v11, %v4621_v34  ;;  %v1994_v35 = vadd.f32 %v1993_v17, %v1779_v38  ;;  %v1588_v38 = vadd.f32 %v4435_v54, %v4639_v2  ;;  %v4641_v44 = vld [vmem:[#allocation49_spill] sm:$0xff] }
 0x1fa   :  { %v1919_v49 = vpop.f32.mrf.mxu0  ;;  %v1997_v13 = vpop.f32.mrf.mxu1  ;;  %v1801_v11 = vadd.f32 %v4641_v44, %v1586_v22  ;;  %v4642_v17 = vld [vmem:[#allocation25_spill] sm:$0xff] }
 0x1fb   :  { %2036 = vst.msk [vmem:[#allocation2 + $0x78] sm:$0xff] %vm2021_vm1, %v1916_v6  ;;  %2062 = vst.msk [vmem:[#allocation2 + $0x148] sm:$0xff] %vm2021_vm1, %v1994_v35  ;;  %v1920_v14 = vadd.f32 %v1919_v49, %v4625_v46  ;;  %v1998_v57 = vadd.f32 %v1997_v13, %v1783_v45  ;;  %v1803_v54 = vadd.f32 %v4437_v19, %v1588_v38  ;;  %v4644_v13 = vld [vmem:[#allocation27_spill] sm:$0xff]  ;;  %v4645_v19 = vld [vmem:[#allocation28_spill] sm:$0xff] }
 0x1fc   :  { %v1921_v53 = vpop.f32.mrf.mxu0  ;;  %v1999_v8 = vpop.f32.mrf.mxu1  ;;  %v4646_v46 = vld [vmem:[#allocation29_spill] sm:$0xff] }
 0x1fd   :  { %2037 = vst [vmem:[#allocation2 + $0x80] sm:$0xff] %v1920_v14  ;;  %2063 = vst [vmem:[#allocation2 + $0x150] sm:$0xff] %v1998_v57  ;;  %v1922_v50 = vadd.f32 %v1921_v53, %v4629_v7  ;;  %v2000_v33 = vadd.f32 %v1999_v8, %v1785_v48 }
 0x1fe   :  { %v1925_v47 = vpop.f32.mrf.mxu0  ;;  %v2003_v40 = vpop.f32.mrf.mxu1 }
 0x1ff   :  { %2038 = vst.msk [vmem:[#allocation2 + $0x88] sm:$0xff] %vm2021_vm1, %v1922_v50  ;;  %2064 = vst.msk [vmem:[#allocation2 + $0x158] sm:$0xff] %vm2021_vm1, %v2000_v33  ;;  %v1926_v31 = vadd.f32 %v1925_v47, %v4633_v43  ;;  %v2004_v55 = vadd.f32 %v2003_v40, %v1789_v25 }
 0x200   :  { %v1927_v61 = vpop.f32.mrf.mxu0  ;;  %v2005_v29 = vpop.f32.mrf.mxu1 }
 0x201   :  { %2039 = vst [vmem:[#allocation2 + $0x90] sm:$0xff] %v1926_v31  ;;  %2065 = vst [vmem:[#allocation2 + $0x160] sm:$0xff] %v2004_v55  ;;  %v1928_v59 = vadd.f32 %v1927_v61, %v4637_v39  ;;  %v2006_v27 = vadd.f32 %v2005_v29, %v1791_v21 }
 0x202   :  { %v1931_v0 = vpop.f32.mrf.mxu0  ;;  %v2009_v58 = vpop.f32.mrf.mxu1 }
 0x203   :  { %2040 = vst.msk [vmem:[#allocation2 + $0x98] sm:$0xff] %vm2021_vm1, %v1928_v59  ;;  %2066 = vst.msk [vmem:[#allocation2 + $0x168] sm:$0xff] %vm2021_vm1, %v2006_v27  ;;  %v1932_v41 = vadd.f32 %v1931_v0, %v4640_v1  ;;  %v2010_v18 = vadd.f32 %v2009_v58, %v1795_v15 }
 0x204   :  { %v1933_v56 = vpop.f32.mrf.mxu0  ;;  %v2011_v4 = vpop.f32.mrf.mxu1 }
 0x205   :  { %2041 = vst [vmem:[#allocation2 + $0xa0] sm:$0xff] %v1932_v41  ;;  %2067 = vst [vmem:[#allocation2 + $0x170] sm:$0xff] %v2010_v18  ;;  %v1934_v28 = vadd.f32 %v1933_v56, %v4642_v17  ;;  %v2012_v45 = vadd.f32 %v2011_v4, %v1797_v37 }
 0x206   :  { %v1937_v9 = vpop.f32.mrf.mxu0  ;;  %v2015_v26 = vpop.f32.mrf.mxu1 }
 0x207   :  { %2042 = vst.msk [vmem:[#allocation2 + $0xa8] sm:$0xff] %vm2021_vm1, %v1934_v28  ;;  %2068 = vst.msk [vmem:[#allocation2 + $0x178] sm:$0xff] %vm2021_vm1, %v2012_v45  ;;  %v1938_v34 = vadd.f32 %v1937_v9, %v4643_v62  ;;  %v2016_v6 = vadd.f32 %v2015_v26, %v1801_v11 }
 0x208   :  { %v1939_v35 = vpop.f32.mrf.mxu0  ;;  %v2017_v49 = vpop.f32.mrf.mxu1 }
 0x209   :  { %2043 = vst [vmem:[#allocation2 + $0xb0] sm:$0xff] %v1938_v34  ;;  %2069 = vst [vmem:[#allocation2 + $0x180] sm:$0xff] %v2016_v6  ;;  %v1940_v16 = vadd.f32 %v1939_v35, %v4644_v13  ;;  %v2018_v48 = vadd.f32 %v2017_v49, %v1803_v54 }
 0x20a   :  { %v1943_v20 = vpop.f32.mrf.mxu0 }
 0x20b   :  { %2044 = vst.msk [vmem:[#allocation2 + $0xb8] sm:$0xff] %vm2021_vm1, %v1940_v16  ;;  %2070 = vst.msk [vmem:[#allocation2 + $0x188] sm:$0xff] %vm2021_vm1, %v2018_v48  ;;  %v1944_v3 = vadd.f32 %v1943_v20, %v4645_v19 }
 0x20c   :  { %v1945_v10 = vpop.f32.mrf.mxu0 }
 0x20d   :  { %2045 = vst [vmem:[#allocation2 + $0xc0] sm:$0xff] %v1944_v3  ;;  %v1946_v14 = vadd.f32 %v1945_v10, %v4646_v46 }
 0x20f   :  { %2046 = vst.msk [vmem:[#allocation2 + $0xc8] sm:$0xff] %vm2021_vm1, %v1946_v14 }
 0x210   :  { %2170 = shalt.err (!%p2167_p4)
}
 0x211   :  { %s2182_s30 = smov 256   ;;  %s2183_s4 = smov 16  }
 0x212   :  { %2082 = dma.vmem_to_hbm [thread:$0]  %s2077_s28, 6400, %s4556_s3, [#allocation3], %s2182_s30, %s2182_s30, %s2183_s4  }
 0x213   :  { %2179 = dma.done.wait [#allocation3], 6400  }
 0x214   :  { %2180 = vsyncadd [#allocation3], 4294960896 }
 0x215   :  { %2086 = vsyncpa [#allocation3], 1 }

</bundles_post_ra>
